<compile_context>
chip_gen: v6e
topology: v6e:2x2x1
jax: 0.10.0
libtpu: 0.0.40
codegen_flags: <defaults>
</compile_context>

<pallas_src>
from functools import partial
import math

import jax
import jax.numpy as jnp
import numpy as np
from jax.experimental import pallas as pl
from jax.experimental.pallas import tpu as pltpu


def _round_up(x: int, m: int) -> int:
    return (x + m - 1) // m * m


# ---------------------------------------------------------------------------
# Pallas kernel: one fused GCN layer (tiled aggregation + epilogue)
# ---------------------------------------------------------------------------
def gcn_layer_kernel(*refs, project: bool, apply_relu: bool):
    """grid = (row tiles, K tiles); refs =
         (adj, y, [w], b, inorm, out, acc)  -- w only present when project.

    adj tile : (TM, TK) bf16 0/1 mask
    y tile   : (TK, FY) f32 pre-normalized (and maybe pre-projected) features
    w        : (FY, FO) f32, resident            (only when project=True)
    b        : (1, FO)  f32, resident
    inorm    : (TM, 1)  f32 right norm for this row tile
    out tile : (TM, FO) f32
    acc      : (TM, FY) f32 VMEM scratch accumulator
    """
    if project:
        adj_ref, y_ref, w_ref, b_ref, inorm_ref, o_ref, acc_ref = refs
    else:
        adj_ref, y_ref, b_ref, inorm_ref, o_ref, acc_ref = refs
        w_ref = None

    k = pl.program_id(1)

    @pl.when(k == 0)
    def _():
        acc_ref[...] = jnp.zeros_like(acc_ref)

    # bf16 0/1 mask -> f32 (exact); matmul accumulates in full f32.
    adj = adj_ref[...].astype(jnp.float32)
    acc_ref[...] += jnp.dot(adj, y_ref[...], preferred_element_type=jnp.float32)

    @pl.when(k == pl.num_programs(1) - 1)
    def _():
        acc = acc_ref[...]
        if project:  # aggregate-first branch: project after the reduction
            acc = jnp.dot(acc, w_ref[...], preferred_element_type=jnp.float32)
        rst = acc * inorm_ref[...] + b_ref[...]
        if apply_relu:
            rst = jnp.maximum(rst, 0.0)
        o_ref[...] = rst


# ---------------------------------------------------------------------------
# One GCNLayer forward on padded inputs
# ---------------------------------------------------------------------------
def gcn_layer(adj_p, h_p, w, b, onorm_p, inorm_p, *, apply_relu,
              tm=256, tk=512):
    n_pad = adj_p.shape[0]
    fin, fout = w.shape
    fin_p = _round_up(fin, 128)
    fout_p = _round_up(fout, 128)
    assert h_p.shape == (n_pad, fin_p)
    assert n_pad % tm == 0 and n_pad % tk == 0

    # zero-padded parameters: padded rows/cols contribute exactly zero
    w_p = jnp.zeros((fin_p, fout_p), jnp.float32).at[:fin, :fout].set(w)
    b_p = jnp.zeros((1, fout_p), jnp.float32).at[0, :fout].set(b)

    # left ('both') norm folded into the features once, outside the kernel
    x_s = h_p * onorm_p

    project = fin <= fout  # DGL branch: aggregate first, project in-kernel
    if project:
        y = x_s                                                   # (Np, fin_p)
    else:
        # in_feats > out_feats: project first (cheap), aggregate the narrow one
        y = jnp.dot(x_s, w_p, preferred_element_type=jnp.float32,
                    precision=jax.lax.Precision.HIGHEST)          # (Np, fout_p)
    fy = y.shape[1]

    grid = (n_pad // tm, n_pad // tk)

    in_specs = [
        pl.BlockSpec((tm, tk), lambda i, k: (i, k)),     # adj (bf16 stream)
        pl.BlockSpec((tk, fy), lambda i, k: (k, 0)),     # features
    ]
    inputs = [adj_p, y]
    if project:
        in_specs.append(pl.BlockSpec((fin_p, fout_p), lambda i, k: (0, 0)))
        inputs.append(w_p)                               # tiny resident weight
    in_specs += [
        pl.BlockSpec((1, fout_p), lambda i, k: (0, 0)),  # bias, resident
        pl.BlockSpec((tm, 1), lambda i, k: (i, 0)),      # right norm row tile
    ]
    inputs += [b_p, inorm_p]

    out_spec = pl.BlockSpec((tm, fout_p), lambda i, k: (i, 0))

    flops = 2 * n_pad * n_pad * fy
    if project:
        flops += 2 * n_pad * fy * fout_p
    bytes_accessed = (adj_p.size * 2 + y.size * 4 + inorm_p.size * 4
                      + b_p.size * 4 + n_pad * fout_p * 4
                      + (w_p.size * 4 if project else 0))

    kernel = partial(gcn_layer_kernel, project=project, apply_relu=apply_relu)

    return pl.pallas_call(
        kernel,
        out_shape=jax.ShapeDtypeStruct((n_pad, fout_p), jnp.float32),
        grid_spec=pltpu.PrefetchScalarGridSpec(
            num_scalar_prefetch=0,
            grid=grid,
            in_specs=in_specs,
            out_specs=out_spec,
            scratch_shapes=[pltpu.VMEM((tm, fy), jnp.float32)],
        ),
        compiler_params=pltpu.CompilerParams(
            dimension_semantics=("parallel", "arbitrary")),
        cost_estimate=pl.CostEstimate(
            flops=int(flops), transcendentals=0,
            bytes_accessed=int(bytes_accessed)),
    )(*inputs)


# ---------------------------------------------------------------------------
# GCN model: stack of GCNLayers (relu on all but the last)
# ---------------------------------------------------------------------------
def init_gcn_params(key, in_size, hid_size, out_size, n_layers):
    sizes = [in_size] + [hid_size] * (n_layers - 1) + [out_size]
    params = []
    for i in range(n_layers):
        fin, fout = sizes[i], sizes[i + 1]
        key, wk = jax.random.split(key)
        # xavier_uniform_ (gain=1): U(-a, a), a = sqrt(6 / (fan_in + fan_out))
        bound = float(np.sqrt(6.0 / (fin + fout)))
        w = jax.random.uniform(wk, (fin, fout), jnp.float32, -bound, bound)
        b = jnp.zeros((fout,), jnp.float32)
        params.append((w, b))
    return params


def gcn_forward(adj, features, params, *, tm=256, tk=512):
    n = adj.shape[0]
    f_in = features.shape[1]
    out_size = params[-1][0].shape[1]
    n_layers = len(params)

    n_pad = _round_up(n, math.lcm(tm, tk))
    fin_p = _round_up(f_in, 128)

    # ---- graph preprocessing, hoisted: done ONCE for all layers ------------
    out_deg = jnp.maximum(jnp.sum(adj, axis=0), 1.0)   # out-degree of src
    in_deg = jnp.maximum(jnp.sum(adj, axis=1), 1.0)    # in-degree of dst
    onorm = (out_deg ** -0.5).astype(jnp.float32)
    inorm = (in_deg ** -0.5).astype(jnp.float32)
    onorm_p = jnp.zeros((n_pad, 1), jnp.float32).at[:n, 0].set(onorm)
    inorm_p = jnp.zeros((n_pad, 1), jnp.float32).at[:n, 0].set(inorm)

    # adjacency streamed as bf16 (0/1 mask, exactly representable)
    adj_p = (jnp.zeros((n_pad, n_pad), jnp.bfloat16)
             .at[:n, :n].set(adj.astype(jnp.bfloat16)))

    # features zero-padded to lane-dense (multiple-of-128) width
    h = jnp.zeros((n_pad, fin_p), jnp.float32).at[:n, :f_in].set(features)

    for i, (w, b) in enumerate(params):
        h = gcn_layer(adj_p, h, w, b, onorm_p, inorm_p,
                      apply_relu=(i < n_layers - 1), tm=tm, tk=tk)
    return h[:n, :out_size]


# pure-JAX reference of the same math (full f32), for a correctness check
def gcn_forward_ref(adj, features, params):
    hi = jax.lax.Precision.HIGHEST
    n = features.shape[0]
    out_deg = jnp.maximum(jnp.sum(adj, axis=0), 1.0)
    in_deg = jnp.maximum(jnp.sum(adj, axis=1), 1.0)
    onorm = (out_deg ** -0.5).reshape(n, 1)
    inorm = (in_deg ** -0.5).reshape(n, 1)
    h = features
    n_layers = len(params)
    for i, (w, b) in enumerate(params):
        x_s = h * onorm
        if w.shape[0] > w.shape[1]:
            r = jnp.dot(adj, jnp.dot(x_s, w, precision=hi), precision=hi)
        else:
            r = jnp.dot(jnp.dot(adj, x_s, precision=hi), w, precision=hi)
        r = r * inorm + b
        if i < n_layers - 1:
            r = jnp.maximum(r, 0.0)
        h = r
    return h


if __name__ == "__main__":
    key = jax.random.PRNGKey(0)
    k_adj, k_feat, k_param = jax.random.split(key, 3)

    # small synthetic graph: 1000 nodes -> pads to 1024 -> grid (4, 2) with
    # the default 256x512 tiles, exercising both grid axes and padding.
    # Self-loops guarantee in_degree >= 1 (zero-in-degree check of the spec).
    N = 1000
    in_size, hid_size, out_size, n_layers = 96, 64, 10, 3

    rand_edges = (jax.random.uniform(k_adj, (N, N)) < 0.01).astype(jnp.float32)
    adj = jnp.minimum(rand_edges + jnp.eye(N, dtype=jnp.float32), 1.0)

    features = jax.random.normal(k_feat, (N, in_size), jnp.float32)
    params = init_gcn_params(k_param, in_size, hid_size, out_size, n_layers)

    out = jax.block_until_ready(gcn_forward(adj, features, params))
    ref = jax.block_until_ready(gcn_forward_ref(adj, features, params))

    np.testing.assert_allclose(np.asarray(out), np.asarray(ref),
                               rtol=1e-4, atol=1e-4)
    assert out.shape == (N, out_size)
    print("KERNEL_OK")
</pallas_src>

<mosaic_0001>
module attributes {stable_mosaic.version = 11 : i64} {
  func.func @gcn_layer_kernel(%arg0: i32, %arg1: i32, %arg2: memref<256x512xbf16, #tpu.memory_space<vmem>>, %arg3: memref<512x128xf32, #tpu.memory_space<vmem>>, %arg4: memref<1x128xf32, #tpu.memory_space<vmem>>, %arg5: memref<256x1xf32, #tpu.memory_space<vmem>>, %arg6: memref<256x128xf32, #tpu.memory_space<vmem>>, %arg7: memref<256x128xf32, #tpu.memory_space<vmem>>) attributes {dimension_semantics = [#tpu.dimension_semantics<parallel>, #tpu.dimension_semantics<arbitrary>], iteration_bounds = array<i64: 4, 2>, scalar_prefetch = 0 : i64, scratch_operands = 1 : i64, tpu.core_type = #tpu.core_type<tc>, window_params = [{transform_indices = @transform_0, window_bounds = array<i64: 256, 512>}, {transform_indices = @transform_1, window_bounds = array<i64: 512, 128>}, {pipeline_mode = #tpu.pipeline_mode<synchronous>, transform_indices = @transform_2, window_bounds = array<i64: 1, 128>}, {transform_indices = @transform_3, window_bounds = array<i64: 256, 1>}, {transform_indices = @transform_4, window_bounds = array<i64: 256, 128>}]} {
    %c0_i32 = arith.constant 0 : i32
    %0 = arith.cmpi eq, %arg1, %c0_i32 : i32
    %1 = arith.extui %0 : i1 to i32
    %c0_i32_0 = arith.constant 0 : i32
    %2 = arith.cmpi ne, %1, %c0_i32_0 : i32
    scf.if %2 {
      %cst_9 = arith.constant 0.000000e+00 : f32
      %13 = vector.broadcast %cst_9 : f32 to vector<256x128xf32>
      %c0_10 = arith.constant 0 : index
      %c0_11 = arith.constant 0 : index
      %14 = vector.load %arg7[%c0_10, %c0_11] : memref<256x128xf32, #tpu.memory_space<vmem>>, vector<256x128xf32>
      tpu.vector_store %arg7[%c0_10, %c0_11], %13 {strides = array<i32>} : memref<256x128xf32, #tpu.memory_space<vmem>>, vector<256x128xf32>,
    } else {
    }
    %c0 = arith.constant 0 : index
    %c0_1 = arith.constant 0 : index
    %3 = vector.load %arg2[%c0, %c0_1] : memref<256x512xbf16, #tpu.memory_space<vmem>>, vector<256x512xbf16>
    %4 = arith.extf %3 : vector<256x512xbf16> to vector<256x512xf32>
    %c0_2 = arith.constant 0 : index
    %c0_3 = arith.constant 0 : index
    %5 = vector.load %arg7[%c0_2, %c0_3] : memref<256x128xf32, #tpu.memory_space<vmem>>, vector<256x128xf32>
    %c0_4 = arith.constant 0 : index
    %c0_5 = arith.constant 0 : index
    %6 = vector.load %arg3[%c0_4, %c0_5] : memref<512x128xf32, #tpu.memory_space<vmem>>, vector<512x128xf32>
    %cst = arith.constant dense<0.000000e+00> : vector<256x128xf32>
    %7 = tpu.matmul %4, %6, %cst {dimension_numbers = #tpu.dot_dimension_numbers<[1], [0], [0], [1], [0, 0, 1, 1], [], []>} : vector<256x512xf32>, vector<512x128xf32>, vector<256x128xf32> -> vector<256x128xf32>
    %8 = arith.addf %5, %7 : vector<256x128xf32>
    %c0_6 = arith.constant 0 : index
    %c0_7 = arith.constant 0 : index
    %9 = vector.load %arg7[%c0_6, %c0_7] : memref<256x128xf32, #tpu.memory_space<vmem>>, vector<256x128xf32>
    tpu.vector_store %arg7[%c0_6, %c0_7], %8 {strides = array<i32>} : memref<256x128xf32, #tpu.memory_space<vmem>>, vector<256x128xf32>,
    %c1_i32 = arith.constant 1 : i32
    %10 = arith.cmpi eq, %arg1, %c1_i32 : i32
    %11 = arith.extui %10 : i1 to i32
    %c0_i32_8 = arith.constant 0 : i32
    %12 = arith.cmpi ne, %11, %c0_i32_8 : i32
    scf.if %12 {
      %c0_9 = arith.constant 0 : index
      %c0_10 = arith.constant 0 : index
      %13 = vector.load %arg7[%c0_9, %c0_10] : memref<256x128xf32, #tpu.memory_space<vmem>>, vector<256x128xf32>
      %c0_11 = arith.constant 0 : index
      %c0_12 = arith.constant 0 : index
      %14 = vector.load %arg5[%c0_11, %c0_12] : memref<256x1xf32, #tpu.memory_space<vmem>>, vector<256x1xf32>
      %15 = vector.broadcast %14 : vector<256x1xf32> to vector<256x128xf32>
      %16 = arith.mulf %13, %15 : vector<256x128xf32>
      %c0_13 = arith.constant 0 : index
      %c0_14 = arith.constant 0 : index
      %17 = vector.load %arg4[%c0_13, %c0_14] : memref<1x128xf32, #tpu.memory_space<vmem>>, vector<1x128xf32>
      %18 = vector.broadcast %17 : vector<1x128xf32> to vector<256x128xf32>
      %19 = arith.addf %16, %18 : vector<256x128xf32>
      %cst_15 = arith.constant 0.000000e+00 : f32
      %20 = vector.broadcast %cst_15 : f32 to vector<256x128xf32>
      %21 = arith.maximumf %19, %20 : vector<256x128xf32>
      %c0_16 = arith.constant 0 : index
      %c0_17 = arith.constant 0 : index
      %22 = vector.load %arg6[%c0_16, %c0_17] : memref<256x128xf32, #tpu.memory_space<vmem>>, vector<256x128xf32>
      tpu.vector_store %arg6[%c0_16, %c0_17], %21 {strides = array<i32>} : memref<256x128xf32, #tpu.memory_space<vmem>>, vector<256x128xf32>,
    } else {
    }
    return
  }
  func.func @transform_0(%arg0: i32, %arg1: i32) -> (i32, i32) {
    %c0_i32 = arith.constant 0 : i32
    return %arg0, %arg1 : i32, i32
  }
  func.func @transform_1(%arg0: i32, %arg1: i32) -> (i32, i32) {
    %c0_i32 = arith.constant 0 : i32
    %c0_i32_0 = arith.constant 0 : i32
    return %arg1, %c0_i32 : i32, i32
  }
  func.func @transform_2(%arg0: i32, %arg1: i32) -> (i32, i32) {
    %c0_i32 = arith.constant 0 : i32
    %c0_i32_0 = arith.constant 0 : i32
    %c0_i32_1 = arith.constant 0 : i32
    return %c0_i32, %c0_i32_0 : i32, i32
  }
  func.func @transform_3(%arg0: i32, %arg1: i32) -> (i32, i32) {
    %c0_i32 = arith.constant 0 : i32
    %c0_i32_0 = arith.constant 0 : i32
    return %arg0, %c0_i32 : i32, i32
  }
  func.func @transform_4(%arg0: i32, %arg1: i32) -> (i32, i32) {
    %c0_i32 = arith.constant 0 : i32
    %c0_i32_0 = arith.constant 0 : i32
    return %arg0, %c0_i32 : i32, i32
  }
}

</mosaic_0001>

<bundles_post_ra>
// kernel: tpu_custom_call.1
= control target key start
LH: loop header
LB: loop body
LE: loop exit
PB: predicated region body
PF: predicated region fallthrough
CT: control target
= control target key end

     0   :  { %s2721_s0 = inlined_call_operand.hbm [shape: bf16[1024,1024], index: 0, kind: input, shape index: {}]   ;;  %s2722_s1 = inlined_call_operand.hbm [shape: f32[1024,128], index: 1, kind: input, shape index: {}]   ;;  %s2723_s2 = inlined_call_operand.hbm [shape: f32[1,128], index: 2, kind: input, shape index: {}]   ;;  %s2724_s3 = inlined_call_operand.vmem [shape: f32[1024,1], index: 3, kind: input, shape index: {}]   ;;  %s2725_s4 = inlined_call_operand.hbm [shape: f32[1024,128], index: 4, kind: output, shape index: {}]  }
   0x1   :  { %2748 = sst [smem:[#allocation27_spill]] %s2721_s0 }
   0x2   :  { %2749 = sst [smem:[#allocation28_spill]] %s2723_s2 }
   0x3   :  { %2750 = sst [smem:[#allocation29_spill]] %s2724_s3 }
   0x4   :  { %2751 = sst [smem:[#allocation30_spill]] %s2725_s4 }
   0x5   :  { %9 = vsyncpa [#allocation4], 0 }
   0x6   :  { %11 = vsyncpa [#allocation4 + $0x1], 0 }
   0x7   :  { %12 = vsyncpa [#allocation7], 0 }
   0x8   :  { %14 = vsyncpa [#allocation7 + $0x1], 0 }
   0x9   :  { %15 = vsyncpa [#allocation5], 0 }
   0xa   :  { %17 = vsyncpa [#allocation5 + $0x1], 0  ;;  %s2117_s15 = smov 0   ;;  %s2119_s16 = smov 0  }
   0xb   :  { %s2121_s17 = smov 0   ;;  %s2123_s18 = smov 0  }
   0xc   :  { %s2125_s19 = smov 0   ;;  %s2127_s20 = smov 0  }
   0xd   :  { %s2129_s21 = smov 0   ;;  %s2131_s22 = smov 0  }
   0xe   :  { %s2133_s23 = smov 0   ;;  %s2135_s24 = smov 0  }
   0xf   :  { %s2137_s25 = smov 0   ;;  %s2139_s26 = smov 0  }
  0x10   :  { %s2141_s27 = smov 0   ;;  %s2143_s28 = smov 0  }
  0x11 LB: > { %2752 = sst [smem:[#allocation14_spill]] %s2024_s15  ;;  %s2184_s29 = sadd.s32 4294967295, %s2076_s28   ;;  %s2076_s28 = sphi %s2143_s28, %s23_s28   ;;  %s2072_s27 = sphi %s2141_s27, %s2819_s27   ;;  %s2068_s26 = sphi %s2139_s26, %s2818_s26   ;;  %s2064_s25 = sphi %s2137_s25, %s2817_s25   ;;  %s2060_s24 = sphi %s2135_s24, %s2816_s24   ;;  %s2056_s23 = sphi %s2133_s23, %s2815_s23   ;;  %s2052_s22 = sphi %s2131_s22, %s2814_s22   ;;  %s2048_s21 = sphi %s2129_s21, %s2807_s21   ;;  %s2044_s20 = sphi %s2127_s20, %s2813_s20   ;;  %s2040_s19 = sphi %s2125_s19, %s2812_s19   ;;  %s2036_s18 = sphi %s2123_s18, %s2806_s18   ;;  %s2032_s17 = sphi %s2121_s17, %s2811_s17   ;;  %s2028_s16 = sphi %s2119_s16, %s2810_s16   ;;  %s2024_s15 = sphi %s2117_s15, %s2805_s15  }
  0x12   : > { %2753 = sst [smem:[#allocation15_spill]] %s2028_s16  ;;  %s1658_s30 = sadd.s32 4294967294, %s2076_s28  }
  0x13   : > { %2754 = sst [smem:[#allocation16_spill]] %s2040_s19  ;;  %p51_p0 = scmp.ne.s32.totalorder %s2056_s23, %s2052_s22 }
  0x14   : > { %2755 = sst [smem:[#allocation17_spill]] %s2052_s22  ;;  %p52_p1 = scmp.eq.s32.totalorder %s2076_s28, 0 }
  0x15   : > { %2756 = sst [smem:[#allocation18_spill]] %s2060_s24  ;;  %p57_p2 = scmp.ne.s32.totalorder %s2052_s22, %s2048_s21 }
  0x16   : > { %2757 = sst [smem:[#allocation19_spill]] %s2064_s25  ;;  %p2726_p3 = scmp.eq.s32.totalorder %s2184_s29, 0 }
  0x17   : > { %2758 = sst [smem:[#allocation20_spill]] %s2184_s29  ;;  %p2194_p4 = por %p52_p1, %p51_p0 }
  0x18   : > { %p77_p5 = scmp.ne.s32.totalorder %s2044_s20, %s2040_s19  ;;  %p2202_p6 = por %p2726_p3, %p57_p2 }
  0x19   : > { %p83_p7 = scmp.ne.s32.totalorder %s2040_s19, %s2036_s18  ;;  %p153_p10 = scmp.ne.s32.totalorder %s2032_s17, %s2028_s16 }
  0x1a   : > { %s2760_s8 = scalar_select %p2202_p6, 1, 0 }
  0x1b   : > { %p2207_p8 = por %p77_p5, %p52_p1  ;;  %p2214_p9 = por %p83_p7, %p2726_p3 }
  0x1c   : > { %2761 = sst [smem:[#allocation21_spill]] %s2760_s8  ;;  %p154_p11 = scmp.eq.s32.totalorder %s2184_s29, 7 }
  0x1d   : > { %s2763_s11 = scalar_select %p2214_p9, 1, 0 }
  0x1e   : > { %p159_p12 = scmp.ne.s32.totalorder %s2028_s16, %s2024_s15  ;;  %p160_p13 = scmp.eq.s32.totalorder %s1658_s30, 7 }
  0x1f   : > { %2764 = sst [smem:[#allocation22_spill]] %s2763_s11  ;;  %p1659_p0 = scmp.ge.s32.totalorder %s2076_s28, 1 }
  0x20   : > { %p2224_p2 = por %p154_p11, %p153_p10  ;;  %p167_p1 = scmp.lt.s32.totalorder %s2076_s28, 9 }
  0x21   : > { %p2229_p5 = por %p160_p13, %p159_p12  ;;  %s2078_s18 = smov [#allocation8]  }
  0x22   : > { %s2765_s12 = scalar_select %p2224_p2, 1, 0 }
  0x23   : > { %s2767_s13 = scalar_select %p2229_p5, 1, 0 }
  0x24   : > { %2766 = sst [smem:[#allocation23_spill]] %s2765_s12  ;;  %p2233_p7 = pnand %p1659_p0, %p167_p1 }
  0x25   : > { %2768 = sst [smem:[#allocation24_spill]] %s2767_s13  ;;  %s180_s21 = sshll.u32 %s2078_s18, 4  ;;  %s181_s21 = int_to_ptr.vmem [resolvable:$true] %s180_s21 }
  0x26   : > { %s2769_s14 = scalar_select %p2233_p7, 1, 0 }
  0x27   : > { %p1698_p3 = pneg %p2233_p7  ;;  %p1714_p9 = scmp.lt.s32.totalorder %s2076_s28, 8 }
  0x28   : > { %p2770_p10 = scmp.eq.s32.totalorder %s2184_s29, 0  ;;  %s1853_s18 = scalar_lea.vmem %s181_s21, 16 }
  0x29   : > { %p2248_p12 = pnand %p1714_p9, %p2194_p4  ;;  %p2254_p13 = pnand %p1714_p9, %p2207_p8 }
  0x2a   : > { %p2242_p11 = pnand %p1698_p3, %p2770_p10  ;;  %p1854_p1 = scmp.ne.s32.totalorder %s181_s21, %s1853_s18 }
  0x2b   : > { %s1860_s6 = scalar_lea.vmem %s181_s21, 32  ;;  %p1861_p10 = scmp.lt.s32.totalorder %s181_s21, %s181_s21 }
  0x2c   : > { %p1844_p0 = pneg %p2242_p11  ;;  %p1862_p2 = scmp.lt.s32.totalorder %s1860_s6, %s1853_s18 }
  0x2e   : > { %p1856_p5 = pnand %p1854_p1, %p1844_p0  ;;  %p1863_p6 = por %p1862_p2, %p1861_p10 }
  0x30   : > { %p1857_p3 = pneg %p1856_p5 }
  0x32   : > { %p1864_p7 = pnand %p1863_p6, %p1857_p3 }
  0x34   : > { %1867 = shalt.err (!%p1864_p7)
}
  0x35   : > { %s2774_s2 = sld [smem:[#allocation28_spill]]  ;;  %s35_s13 = sadd.s32 1, %s2072_s27 }
  0x36   : > { %s32_s6 = sadd.s32 1, %s2068_s26  ;;  %s191_s18 = sand.u32 1, %s2056_s23  }
  0x37   : > { %p33_p4 = scmp.ge.s32.totalorder %s32_s6, 2  ;;  %s1662_s15 = sshll.u32 %s191_s18, 9 }
  0x38   : > { %s1664_s30 = sshll.u32 %s2068_s26, 2  ;;  %s195_s9 = scalar_lea.vmem [#allocation3], %s1662_s15 }
  0x39   : > { %s2821_s6 = smov (%p33_p4, %s32_s6), 0  ;;  %s2823_s13 = smov (!%p33_p4, %s35_s13), %s2072_s27 }
  0x3a   : > { %2775 = sst [smem:[#allocation25_spill]] %s2821_s6  ;;  %s40_s7 = ssub.s32 %s2068_s26, %s2821_s6 }
  0x3b   : > { %1701 = dma.hbm_to_vmem [thread:$0]  (!%p2242_p11), %s2774_s2, 16, %s181_s21, [#allocation7]  }
  0x3c   : > { %p37_p6 = scmp.ge.s32.totalorder %s2823_s13, 4  ;;  %p68_p8 = scmp.eq.s32.totalorder %s40_s7, 0 }
  0x3d   : > { %s1685_s21 = sshll.u32 %s2072_s27, 8  ;;  %s205_s2 = sshll.u32 %s195_s9, 4  ;;  %s206_s2 = int_to_ptr.vmem [resolvable:$true] %s205_s2 }
  0x3e   : > { %s2825_s13 = smov (%p37_p6, %s2823_s13), 0  ;;  %s2777_s4 = sadd.s32 1, %s2044_s20 }
  0x3f   : > { %2776 = sst [smem:[#allocation26_spill]] %s2825_s13  ;;  %s39_s24 = ssub.s32 %s2072_s27, %s2825_s13 }
  0x40   : > { %s2280_s12 = scalar_select %p68_p8, %s2044_s20, %s2777_s4  }
  0x41   : > { %s202_s3 = sadd.s32 %s1685_s21, %s1664_s30  ;;  %s41_s25 = sor.u32 %s40_s7, %s39_s24 }
  0x42   : > { %p141_p9 = scmp.eq.s32.totalorder %s39_s24, 0  ;;  %p42_p2 = scmp.eq.s32.totalorder %s41_s25, 0 }
  0x43   : > { %s1666_s16 = sshll.u32 %s202_s3, 6  ;;  %s2778_s6 = sadd.s32 1, %s2032_s17 }
  0x44   : > { %s2287_s11 = scalar_select %p141_p9, %s2032_s17, %s2778_s6  }
  0x45   : > { %s2779_s19 = sadd.s32 1, %s2056_s23  ;;  %s2780_s0 = sld [smem:[#allocation27_spill]] }
  0x46   : > { %s2292_s29 = scalar_select %p42_p2, %s2056_s23, %s2779_s19  }
  0x47   : > { %s215_s22 = sand.u32 1, %s2076_s28   ;;  %s192_s4 = scalar_lea.sflag [#allocation4], %s191_s18 }
  0x48   : > { %p1870_p5 = pneg %p2248_p12  ;;  %s1881_s30 = scalar_lea.vmem %s206_s2, 8192 }
  0x49   : > { %p1882_p7 = scmp.ne.s32.totalorder %s206_s2, %s1881_s30  ;;  %s2079_s3 = smov [#allocation3]  }
  0x4a   : > { %s1886_s24 = sshll.u32 %s2079_s3, 4  ;;  %s1887_s24 = int_to_ptr.vmem [resolvable:$false] %s1886_s24 }
  0x4b   : > { %s204_s8 = scalar_lea.hbm %s2780_s0, %s1666_s16  ;;  %p1884_p11 = pnand %p1882_p7, %p1870_p5 }
  0x4c   : > { %s1888_s25 = scalar_lea.vmem %s1887_s24, 16384  ;;  %p1889_p1 = scmp.lt.s32.totalorder %s206_s2, %s1887_s24 }
  0x4d   : > { %p1885_p0 = pneg %p1884_p11  ;;  %p1890_p3 = scmp.lt.s32.totalorder %s1888_s25, %s1881_s30 }
  0x4f   : > { %p1891_p10 = por %p1890_p3, %p1889_p1 }
  0x51   : > { %p1892_p4 = pnand %p1891_p10, %p1885_p0 }
  0x53   : > { %1895 = shalt.err (!%p1892_p4)
}
  0x54   : > { %s2080_s19 = smov 512   ;;  %s2081_s16 = smov 256  }
  0x55   : > { %s2082_s6 = smov 16   ;;  %s217_s18 = sand.u32 1, %s2044_s20  }
  0x56   : > { %1705 = dma.hbm_to_vmem [thread:$0]  (!%p2248_p12), %s204_s8, 8192, %s206_s2, %s192_s4, %s2080_s19, %s2081_s16, %s2082_s6  }
  0x57   : > { %s1667_s7 = sshll.u32 %s217_s18, 9  ;;  %s1686_s21 = sshll.u32 %s2068_s26, 13 }
  0x58   : > { %s225_s3 = scalar_lea.hbm %s2722_s1, %s1686_s21  ;;  %s219_s30 = scalar_lea.vmem [#allocation6], %s1667_s7 }
  0x59   : > { %s226_s24 = sshll.u32 %s219_s30, 4  ;;  %s216_s25 = scalar_lea.sflag [#allocation7], %s215_s22  ;;  %s227_s24 = int_to_ptr.vmem [resolvable:$true] %s226_s24 }
  0x5a   : > { %p1898_p6 = pneg %p2254_p13  ;;  %s1909_s0 = scalar_lea.vmem %s227_s24, 8192 }
  0x5b   : > { %p1910_p8 = scmp.ne.s32.totalorder %s227_s24, %s1909_s0  ;;  %s2083_s13 = smov [#allocation6]  }
  0x5c   : > { %s1914_s5 = sshll.u32 %s2083_s13, 4  ;;  %s1915_s5 = int_to_ptr.vmem [resolvable:$false] %s1914_s5 }
  0x5d   : > { %p1912_p9 = pnand %p1910_p8, %p1898_p6  ;;  %s1916_s2 = scalar_lea.vmem %s1915_s5, 16384 }
  0x5e   : > { %p1917_p12 = scmp.lt.s32.totalorder %s227_s24, %s1915_s5  ;;  %p1918_p5 = scmp.lt.s32.totalorder %s1916_s2, %s1909_s0 }
  0x5f   : > { %p1913_p2 = pneg %p1912_p9 }
  0x60   : > { %p1919_p7 = por %p1918_p5, %p1917_p12 }
  0x62   : > { %p1920_p11 = pnand %p1919_p7, %p1913_p2 }
  0x64   : > { %1923 = shalt.err (!%p1920_p11)
}
  0x65   : > { %s2084_s8 = smov 128   ;;  %s2085_s4 = smov 8  }
  0x66   : > { %1708 = dma.hbm_to_vmem [thread:$0]  (!%p2254_p13), %s225_s3, 8192, %s227_s24, %s216_s25, %s2084_s8, %s2084_s8, %s2085_s4  }
  0x67   : > { %p2781_p0 = scmp.ne.s32.totalorder %s2769_s14, 0 }
  0x68   : > { %s2782_s22 = sld [smem:[#allocation17_spill]] (!%p2781_p0) }
  0x69   : > { %247 = sbr.rel (%p2781_p0) target bundleno = 771 (0x303), region = 36  ;;  %s2783_s19 = sld [smem:[#allocation21_spill]] (!%p2781_p0) }
  0x6e   : > { %s249_s16 = sand.u32 1, %s2782_s22  }
  0x6f   : > { %s1671_s6 = sshll.u32 %s249_s16, 9  ;;  %s250_s13 = scalar_lea.sflag [#allocation4], %s249_s16 }
  0x70   : > { %s2314_s18 = scalar_lea.vmem [#allocation3], %s1671_s6  ;;  %p2784_p1 = scmp.ne.s32.totalorder %s2783_s19, 0 }
  0x72   : > { %2007 = dma.done.wait (%p2784_p1), %s250_s13, 8192  }
  0x73   : > { %2009 = vsyncadd (%p2784_p1), %s250_s13, 4294959104  ;;  %s2785_s0 = sld [smem:[#allocation20_spill]] }
  0x74   : > { %s2786_s7 = sld [smem:[#allocation16_spill]] }
  0x75   : > { %s2787_s21 = sld [smem:[#allocation22_spill]] }
  0x79   : > { %s258_s10 = sand.u32 1, %s2785_s0  }
  0x7a   : > { %s260_s15 = sand.u32 1, %s2786_s7   ;;  %s259_s14 = scalar_lea.sflag [#allocation7], %s258_s10 }
  0x7b   : > { %s1672_s9 = sshll.u32 %s260_s15, 9  ;;  %p2788_p13 = scmp.ne.s32.totalorder %s2787_s21, 0 }
  0x7c   : > { %s2322_s3 = scalar_lea.vmem [#allocation6], %s1672_s9 }
  0x7d   : > { %2011 = dma.done.wait (%p2788_p13), %s259_s14, 8192  }
  0x7e   : > { %2013 = vsyncadd (%p2788_p13), %s259_s14, 4294959104  ;;  %p2789_p3 = scmp.eq.s32.totalorder %s2785_s0, 0 }
  0x80   : > { %2015 = dma.done.wait (%p2789_p3), [#allocation7], 16   ;;  %p2790_p10 = pmov %p2789_p3 }
  0x81   : > { %s2791_s30 = sld [smem:[#allocation15_spill]] }
  0x82   : > { %2017 = vsyncadd (%p2790_p10), [#allocation7], 4294967280  ;;  %s2792_s24 = sld [smem:[#allocation19_spill]] }
  0x83   : > { %s2793_s19 = sld [smem:[#allocation29_spill]] }
  0x84   : > { %s2794_s13 = sld [smem:[#allocation18_spill]] }
  0x87   : > { %s298_s25 = sand.u32 1, %s2791_s30  }
  0x88   : > { %s1675_s5 = sshll.u32 %s2792_s24, 5  ;;  %s1674_s2 = sshll.u32 %s298_s25, 8 }
  0x89   : > { %p305_p4 = scmp.lt.s32.totalorder %s1675_s5, 127  ;;  %s2341_s6 = scalar_lea.vmem [#allocation9], %s1674_s2 }
  0x8a   : > { %p1677_p6 = scmp.ne.s32.totalorder %s2794_s13, 0 }
  0x8b   : > { %s2827_s5 = smov (!%p305_p4, %s1675_s5), 127 }
  0x8c   : > { %s1676_s8 = sshll.u32 %s2827_s5, 3  ;;  %314 = sbr.rel (%p1677_p6) target bundleno = 162 (0xa2), region = 52 }
  0x8d   : > { %s2339_s16 = scalar_lea.vmem %s2793_s19, %s1676_s8 }
  0x91   : > { %v2086_v0 = vmov 0.0  }
  0x92   : > { %315 = vst [vmem:[#allocation2 + $0xb0] sm:$0xff] %v2086_v0  ;;  %316 = vst [vmem:[#allocation2] sm:$0xff] %v2086_v0 }
  0x93   : > { %317 = vst [vmem:[#allocation2 + $0xd8] sm:$0xff] %v2086_v0  ;;  %318 = vst [vmem:[#allocation2 + $0x18] sm:$0xff] %v2086_v0 }
  0x94   : > { %319 = vst [vmem:[#allocation2 + $0x50] sm:$0xff] %v2086_v0  ;;  %320 = vst [vmem:[#allocation2 + $0x68] sm:$0xff] %v2086_v0 }
  0x95   : > { %321 = vst [vmem:[#allocation2 + $0x30] sm:$0xff] %v2086_v0  ;;  %322 = vst [vmem:[#allocation2 + $0x48] sm:$0xff] %v2086_v0 }
  0x96   : > { %323 = vst [vmem:[#allocation2 + $0x80] sm:$0xff] %v2086_v0  ;;  %324 = vst [vmem:[#allocation2 + $0x88] sm:$0xff] %v2086_v0 }
  0x97   : > { %325 = vst [vmem:[#allocation2 + $0xe8] sm:$0xff] %v2086_v0  ;;  %326 = vst [vmem:[#allocation2 + $0xb8] sm:$0xff] %v2086_v0 }
  0x98   : > { %327 = vst [vmem:[#allocation2 + $0x60] sm:$0xff] %v2086_v0  ;;  %328 = vst [vmem:[#allocation2 + $0xf0] sm:$0xff] %v2086_v0 }
  0x99   : > { %329 = vst [vmem:[#allocation2 + $0x8] sm:$0xff] %v2086_v0  ;;  %330 = vst [vmem:[#allocation2 + $0x78] sm:$0xff] %v2086_v0 }
  0x9a   : > { %331 = vst [vmem:[#allocation2 + $0x38] sm:$0xff] %v2086_v0  ;;  %332 = vst [vmem:[#allocation2 + $0x58] sm:$0xff] %v2086_v0 }
  0x9b   : > { %333 = vst [vmem:[#allocation2 + $0x40] sm:$0xff] %v2086_v0  ;;  %334 = vst [vmem:[#allocation2 + $0xc8] sm:$0xff] %v2086_v0 }
  0x9c   : > { %335 = vst [vmem:[#allocation2 + $0xe0] sm:$0xff] %v2086_v0  ;;  %336 = vst [vmem:[#allocation2 + $0x90] sm:$0xff] %v2086_v0 }
  0x9d   : > { %337 = vst [vmem:[#allocation2 + $0x70] sm:$0xff] %v2086_v0  ;;  %338 = vst [vmem:[#allocation2 + $0xc0] sm:$0xff] %v2086_v0 }
  0x9e   : > { %339 = vst [vmem:[#allocation2 + $0xa8] sm:$0xff] %v2086_v0  ;;  %340 = vst [vmem:[#allocation2 + $0xd0] sm:$0xff] %v2086_v0 }
  0x9f   : > { %341 = vst [vmem:[#allocation2 + $0x10] sm:$0xff] %v2086_v0  ;;  %342 = vst [vmem:[#allocation2 + $0x28] sm:$0xff] %v2086_v0 }
  0xa0   : > { %343 = vst [vmem:[#allocation2 + $0xa0] sm:$0xff] %v2086_v0  ;;  %344 = vst [vmem:[#allocation2 + $0xf8] sm:$0xff] %v2086_v0 }
  0xa1   : > { %345 = vst [vmem:[#allocation2 + $0x20] sm:$0xff] %v2086_v0  ;;  %346 = vst [vmem:[#allocation2 + $0x98] sm:$0xff] %v2086_v0 }
  0xa2 PF: > { %v586_v1 = vld [vmem:[%s2322_s3 + $0x78] sm:$0xff]  ;;  %v2087_v3 = vmov 0.0   ;;  %v585_v4 = vld [vmem:[%s2322_s3 + $0x70] sm:$0xff]  ;;  %v584_v6 = vld [vmem:[%s2322_s3 + $0x68] sm:$0xff] }
  0xa3   : > { %v618_v2 = vld [vmem:[%s2322_s3 + $0x178] sm:$0xff]  ;;  %635 = vmatprep.subr.mxu0 %v2087_v3  ;;  %860 = vmatprep.subr.mxu1 %v2087_v3  ;;  %v617_v5 = vld [vmem:[%s2322_s3 + $0x170] sm:$0xff]  ;;  %v616_v7 = vld [vmem:[%s2322_s3 + $0x168] sm:$0xff] }
  0xa4   : > { %636 = vmatpush1.msra.mxu0 %v586_v1  ;;  %861 = vmatpush1.msra.mxu1 %v618_v2  ;;  %v583_v8 = vld [vmem:[%s2322_s3 + $0x60] sm:$0xff]  ;;  %v582_v10 = vld [vmem:[%s2322_s3 + $0x58] sm:$0xff]  ;;  %v581_v12 = vld [vmem:[%s2322_s3 + $0x50] sm:$0xff] }
  0xa5   : > { %637 = vmatprep.subr.mxu0 %v2087_v3  ;;  %862 = vmatprep.subr.mxu1 %v2087_v3  ;;  %v615_v9 = vld [vmem:[%s2322_s3 + $0x160] sm:$0xff]  ;;  %v614_v11 = vld [vmem:[%s2322_s3 + $0x158] sm:$0xff]  ;;  %v613_v13 = vld [vmem:[%s2322_s3 + $0x150] sm:$0xff] }
  0xa6   : > { %638 = vmatpush1.msra.mxu0 %v585_v4  ;;  %863 = vmatpush1.msra.mxu1 %v617_v5  ;;  %v580_v14 = vld [vmem:[%s2322_s3 + $0x48] sm:$0xff]  ;;  %v579_v16 = vld [vmem:[%s2322_s3 + $0x40] sm:$0xff]  ;;  %v578_v18 = vld [vmem:[%s2322_s3 + $0x38] sm:$0xff] }
  0xa7   : > { %639 = vmatprep.subr.mxu0 %v2087_v3  ;;  %864 = vmatprep.subr.mxu1 %v2087_v3  ;;  %v612_v15 = vld [vmem:[%s2322_s3 + $0x148] sm:$0xff]  ;;  %v611_v17 = vld [vmem:[%s2322_s3 + $0x140] sm:$0xff]  ;;  %v610_v19 = vld [vmem:[%s2322_s3 + $0x138] sm:$0xff] }
  0xa8   : > { %640 = vmatpush1.msra.mxu0 %v584_v6  ;;  %865 = vmatpush1.msra.mxu1 %v616_v7  ;;  %v577_v20 = vld [vmem:[%s2322_s3 + $0x30] sm:$0xff]  ;;  %v576_v22 = vld [vmem:[%s2322_s3 + $0x28] sm:$0xff]  ;;  %v575_v24 = vld [vmem:[%s2322_s3 + $0x20] sm:$0xff] }
  0xa9   : > { %641 = vmatprep.subr.mxu0 %v2087_v3  ;;  %866 = vmatprep.subr.mxu1 %v2087_v3  ;;  %v609_v21 = vld [vmem:[%s2322_s3 + $0x130] sm:$0xff]  ;;  %v608_v23 = vld [vmem:[%s2322_s3 + $0x128] sm:$0xff]  ;;  %v607_v25 = vld [vmem:[%s2322_s3 + $0x120] sm:$0xff] }
  0xaa   : > { %642 = vmatpush1.msra.mxu0 %v583_v8  ;;  %867 = vmatpush1.msra.mxu1 %v615_v9  ;;  %v574_v26 = vld [vmem:[%s2322_s3 + $0x18] sm:$0xff]  ;;  %v573_v28 = vld [vmem:[%s2322_s3 + $0x10] sm:$0xff]  ;;  %v572_v30 = vld [vmem:[%s2322_s3 + $0x8] sm:$0xff] }
  0xab   : > { %643 = vmatprep.subr.mxu0 %v2087_v3  ;;  %868 = vmatprep.subr.mxu1 %v2087_v3  ;;  %v606_v27 = vld [vmem:[%s2322_s3 + $0x118] sm:$0xff]  ;;  %v605_v29 = vld [vmem:[%s2322_s3 + $0x110] sm:$0xff]  ;;  %v604_v31 = vld [vmem:[%s2322_s3 + $0x108] sm:$0xff] }
  0xac   : > { %644 = vmatpush1.msra.mxu0 %v582_v10  ;;  %869 = vmatpush1.msra.mxu1 %v614_v11  ;;  %v571_v32 = vld [vmem:[%s2322_s3] sm:$0xff]  ;;  %v602_v34 = vld [vmem:[%s2322_s3 + $0xf8] sm:$0xff]  ;;  %v601_v36 = vld [vmem:[%s2322_s3 + $0xf0] sm:$0xff] }
  0xad   : > { %645 = vmatprep.subr.mxu0 %v2087_v3  ;;  %870 = vmatprep.subr.mxu1 %v2087_v3  ;;  %v603_v33 = vld [vmem:[%s2322_s3 + $0x100] sm:$0xff]  ;;  %v634_v35 = vld [vmem:[%s2322_s3 + $0x1f8] sm:$0xff]  ;;  %v633_v37 = vld [vmem:[%s2322_s3 + $0x1f0] sm:$0xff] }
  0xae   : > { %646 = vmatpush1.msra.mxu0 %v581_v12  ;;  %871 = vmatpush1.msra.mxu1 %v613_v13  ;;  %v600_v38 = vld [vmem:[%s2322_s3 + $0xe8] sm:$0xff]  ;;  %v599_v40 = vld [vmem:[%s2322_s3 + $0xe0] sm:$0xff]  ;;  %v598_v42 = vld [vmem:[%s2322_s3 + $0xd8] sm:$0xff] }
  0xaf   : > { %647 = vmatprep.subr.mxu0 %v2087_v3  ;;  %872 = vmatprep.subr.mxu1 %v2087_v3  ;;  %v632_v39 = vld [vmem:[%s2322_s3 + $0x1e8] sm:$0xff]  ;;  %v631_v41 = vld [vmem:[%s2322_s3 + $0x1e0] sm:$0xff]  ;;  %v630_v43 = vld [vmem:[%s2322_s3 + $0x1d8] sm:$0xff] }
  0xb0   : > { %648 = vmatpush1.msra.mxu0 %v580_v14  ;;  %873 = vmatpush1.msra.mxu1 %v612_v15  ;;  %v597_v44 = vld [vmem:[%s2322_s3 + $0xd0] sm:$0xff]  ;;  %v596_v46 = vld [vmem:[%s2322_s3 + $0xc8] sm:$0xff]  ;;  %v595_v48 = vld [vmem:[%s2322_s3 + $0xc0] sm:$0xff] }
  0xb1   : > { %649 = vmatprep.subr.mxu0 %v2087_v3  ;;  %874 = vmatprep.subr.mxu1 %v2087_v3  ;;  %v629_v45 = vld [vmem:[%s2322_s3 + $0x1d0] sm:$0xff]  ;;  %v628_v47 = vld [vmem:[%s2322_s3 + $0x1c8] sm:$0xff]  ;;  %v627_v49 = vld [vmem:[%s2322_s3 + $0x1c0] sm:$0xff] }
  0xb2   : > { %650 = vmatpush1.msra.mxu0 %v579_v16  ;;  %875 = vmatpush1.msra.mxu1 %v611_v17  ;;  %v594_v50 = vld [vmem:[%s2322_s3 + $0xb8] sm:$0xff]  ;;  %v593_v52 = vld [vmem:[%s2322_s3 + $0xb0] sm:$0xff]  ;;  %v592_v54 = vld [vmem:[%s2322_s3 + $0xa8] sm:$0xff] }
  0xb3   : > { %651 = vmatprep.subr.mxu0 %v2087_v3  ;;  %876 = vmatprep.subr.mxu1 %v2087_v3  ;;  %v626_v51 = vld [vmem:[%s2322_s3 + $0x1b8] sm:$0xff]  ;;  %v625_v53 = vld [vmem:[%s2322_s3 + $0x1b0] sm:$0xff]  ;;  %v624_v55 = vld [vmem:[%s2322_s3 + $0x1a8] sm:$0xff] }
  0xb4   : > { %652 = vmatpush1.msra.mxu0 %v578_v18  ;;  %877 = vmatpush1.msra.mxu1 %v610_v19  ;;  %v591_v56 = vld [vmem:[%s2322_s3 + $0xa0] sm:$0xff]  ;;  %v590_v58 = vld [vmem:[%s2322_s3 + $0x98] sm:$0xff]  ;;  %v589_v60 = vld [vmem:[%s2322_s3 + $0x90] sm:$0xff] }
  0xb5   : > { %653 = vmatprep.subr.mxu0 %v2087_v3  ;;  %878 = vmatprep.subr.mxu1 %v2087_v3  ;;  %v623_v57 = vld [vmem:[%s2322_s3 + $0x1a0] sm:$0xff]  ;;  %v622_v59 = vld [vmem:[%s2322_s3 + $0x198] sm:$0xff]  ;;  %v621_v61 = vld [vmem:[%s2322_s3 + $0x190] sm:$0xff] }
  0xb6   : > { %654 = vmatpush1.msra.mxu0 %v577_v20  ;;  %879 = vmatpush1.msra.mxu1 %v609_v21  ;;  %v347_v62 = vld [vmem:[%s2314_s18] sm:$0xff]  ;;  %v348_v63 = vld [vmem:[%s2314_s18 + $0x8] sm:$0xff]  ;;  %v349_v4 = vld [vmem:[%s2314_s18 + $0x10] sm:$0xff] }
  0xb7   : > { %655 = vmatprep.subr.mxu0 %v2087_v3  ;;  %880 = vmatprep.subr.mxu1 %v2087_v3  ;;  %v588_v0 = vld [vmem:[%s2322_s3 + $0x88] sm:$0xff]  ;;  %v412_v2 = vunpack.c.h.bf16 %v347_v62  ;;  %v350_v5 = vld [vmem:[%s2314_s18 + $0x18] sm:$0xff]  ;;  %v587_v6 = vld [vmem:[%s2322_s3 + $0x80] sm:$0xff]  ;;  %v414_v7 = vunpack.c.h.bf16 %v348_v63  ;;  %v411_v8 = vunpack.c.l.bf16 %v347_v62  ;;  %v413_v10 = vunpack.c.l.bf16 %v348_v63 }
  0xb8   : > { %656 = vmatpush1.msra.mxu0 %v576_v22  ;;  %881 = vmatpush1.msra.mxu1 %v608_v23  ;;  %v620_v1 = vld [vmem:[%s2322_s3 + $0x188] sm:$0xff]  ;;  %v619_v9 = vld [vmem:[%s2322_s3 + $0x180] sm:$0xff]  ;;  %v416_v11 = vunpack.c.h.bf16 %v349_v4  ;;  %v418_v12 = vunpack.c.h.bf16 %v350_v5  ;;  %v415_v15 = vunpack.c.l.bf16 %v349_v4  ;;  %v417_v16 = vunpack.c.l.bf16 %v350_v5  ;;  %v353_v18 = vld [vmem:[%s2314_s18 + $0x30] sm:$0xff] }
  0xb9   : > { %657 = vmatprep.subr.mxu0 %v2087_v3  ;;  %882 = vmatprep.subr.mxu1 %v2087_v3  ;;  %v351_v13 = vld [vmem:[%s2314_s18 + $0x20] sm:$0xff]  ;;  %v352_v14 = vld [vmem:[%s2314_s18 + $0x28] sm:$0xff]  ;;  %v354_v19 = vld [vmem:[%s2314_s18 + $0x38] sm:$0xff]  ;;  %v424_v22 = vunpack.c.h.bf16 %v353_v18 }
  0xba   : > { %658 = vmatpush1.msra.mxu0 %v575_v24  ;;  %883 = vmatpush1.msra.mxu1 %v607_v25  ;;  %v420_v17 = vunpack.c.h.bf16 %v351_v13  ;;  %v419_v20 = vunpack.c.l.bf16 %v351_v13  ;;  %v421_v21 = vunpack.c.l.bf16 %v352_v14  ;;  %v426_v23 = vunpack.c.h.bf16 %v354_v19  ;;  %v355_v24 = vld [vmem:[%s2314_s18 + $0x40] sm:$0xff]  ;;  %v356_v25 = vld [vmem:[%s2314_s18 + $0x48] sm:$0xff]  ;;  %v370_v4 = vld [vmem:[%s2314_s18 + $0xb8] sm:$0xff] }
  0xbb   : > { %659 = vmatprep.subr.mxu0 %v2087_v3  ;;  %884 = vmatprep.subr.mxu1 %v2087_v3 }
  0xbc   : > { %660 = vmatpush1.msra.mxu0 %v574_v26  ;;  %885 = vmatpush1.msra.mxu1 %v606_v27  ;;  %v423_v26 = vunpack.c.l.bf16 %v353_v18  ;;  %v425_v27 = vunpack.c.l.bf16 %v354_v19 }
  0xbd   : > { %661 = vmatprep.subr.mxu0 %v2087_v3  ;;  %886 = vmatprep.subr.mxu1 %v2087_v3 }
  0xbe   : > { %662 = vmatpush1.msra.mxu0 %v573_v28  ;;  %887 = vmatpush1.msra.mxu1 %v605_v29  ;;  %v428_v28 = vunpack.c.h.bf16 %v355_v24  ;;  %v430_v29 = vunpack.c.h.bf16 %v356_v25 }
  0xbf   : > { %663 = vmatprep.subr.mxu0 %v2087_v3  ;;  %888 = vmatprep.subr.mxu1 %v2087_v3 }
  0xc0   : > { %664 = vmatpush1.msra.mxu0 %v572_v30  ;;  %889 = vmatpush1.msra.mxu1 %v604_v31  ;;  %v357_v30 = vld [vmem:[%s2314_s18 + $0x50] sm:$0xff]  ;;  %v358_v31 = vld [vmem:[%s2314_s18 + $0x58] sm:$0xff] }
  0xc1   : > { %665 = vmatprep.subr.mxu0 %v2087_v3  ;;  %890 = vmatprep.subr.mxu1 %v2087_v3 }
  0xc2   : > { %666 = vmatpush1.msra.mxu0 %v571_v32  ;;  %891 = vmatpush1.msra.mxu1 %v603_v33  ;;  %v427_v32 = vunpack.c.l.bf16 %v355_v24  ;;  %v429_v33 = vunpack.c.l.bf16 %v356_v25 }
  0xc3   : > { %667 = vmatprep.subr.mxu0 %v2087_v3  ;;  %892 = vmatprep.subr.mxu1 %v2087_v3 }
  0xc4   : > { %668 = vmatpush2.msra.mxu0 %v602_v34  ;;  %893 = vmatpush2.msra.mxu1 %v634_v35  ;;  %v432_v34 = vunpack.c.h.bf16 %v357_v30  ;;  %v434_v35 = vunpack.c.h.bf16 %v358_v31 }
  0xc5   : > { %669 = vmatprep.subr.mxu0 %v2087_v3  ;;  %894 = vmatprep.subr.mxu1 %v2087_v3 }
  0xc6   : > { %670 = vmatpush2.msra.mxu0 %v601_v36  ;;  %895 = vmatpush2.msra.mxu1 %v633_v37  ;;  %v359_v36 = vld [vmem:[%s2314_s18 + $0x60] sm:$0xff]  ;;  %v360_v37 = vld [vmem:[%s2314_s18 + $0x68] sm:$0xff] }
  0xc7   : > { %671 = vmatprep.subr.mxu0 %v2087_v3  ;;  %896 = vmatprep.subr.mxu1 %v2087_v3 }
  0xc8   : > { %672 = vmatpush2.msra.mxu0 %v600_v38  ;;  %897 = vmatpush2.msra.mxu1 %v632_v39  ;;  %v431_v38 = vunpack.c.l.bf16 %v357_v30  ;;  %v433_v39 = vunpack.c.l.bf16 %v358_v31 }
  0xc9   : > { %673 = vmatprep.subr.mxu0 %v2087_v3  ;;  %898 = vmatprep.subr.mxu1 %v2087_v3 }
  0xca   : > { %674 = vmatpush2.msra.mxu0 %v599_v40  ;;  %899 = vmatpush2.msra.mxu1 %v631_v41  ;;  %v436_v40 = vunpack.c.h.bf16 %v359_v36  ;;  %v438_v41 = vunpack.c.h.bf16 %v360_v37 }
  0xcb   : > { %675 = vmatprep.subr.mxu0 %v2087_v3  ;;  %900 = vmatprep.subr.mxu1 %v2087_v3 }
  0xcc   : > { %676 = vmatpush2.msra.mxu0 %v598_v42  ;;  %901 = vmatpush2.msra.mxu1 %v630_v43  ;;  %v361_v42 = vld [vmem:[%s2314_s18 + $0x70] sm:$0xff]  ;;  %v362_v43 = vld [vmem:[%s2314_s18 + $0x78] sm:$0xff] }
  0xcd   : > { %677 = vmatprep.subr.mxu0 %v2087_v3  ;;  %902 = vmatprep.subr.mxu1 %v2087_v3 }
  0xce   : > { %678 = vmatpush2.msra.mxu0 %v597_v44  ;;  %903 = vmatpush2.msra.mxu1 %v629_v45  ;;  %v435_v44 = vunpack.c.l.bf16 %v359_v36  ;;  %v437_v45 = vunpack.c.l.bf16 %v360_v37 }
  0xcf   : > { %679 = vmatprep.subr.mxu0 %v2087_v3  ;;  %904 = vmatprep.subr.mxu1 %v2087_v3 }
  0xd0   : > { %680 = vmatpush2.msra.mxu0 %v596_v46  ;;  %905 = vmatpush2.msra.mxu1 %v628_v47  ;;  %v440_v46 = vunpack.c.h.bf16 %v361_v42  ;;  %v442_v47 = vunpack.c.h.bf16 %v362_v43 }
  0xd1   : > { %681 = vmatprep.subr.mxu0 %v2087_v3  ;;  %906 = vmatprep.subr.mxu1 %v2087_v3 }
  0xd2   : > { %682 = vmatpush2.msra.mxu0 %v595_v48  ;;  %907 = vmatpush2.msra.mxu1 %v627_v49  ;;  %v363_v48 = vld [vmem:[%s2314_s18 + $0x80] sm:$0xff]  ;;  %v364_v49 = vld [vmem:[%s2314_s18 + $0x88] sm:$0xff] }
  0xd3   : > { %683 = vmatprep.subr.mxu0 %v2087_v3  ;;  %908 = vmatprep.subr.mxu1 %v2087_v3 }
  0xd4   : > { %684 = vmatpush2.msra.mxu0 %v594_v50  ;;  %909 = vmatpush2.msra.mxu1 %v626_v51  ;;  %v439_v50 = vunpack.c.l.bf16 %v361_v42  ;;  %v441_v51 = vunpack.c.l.bf16 %v362_v43 }
  0xd5   : > { %685 = vmatprep.subr.mxu0 %v2087_v3  ;;  %910 = vmatprep.subr.mxu1 %v2087_v3 }
  0xd6   : > { %686 = vmatpush2.msra.mxu0 %v593_v52  ;;  %911 = vmatpush2.msra.mxu1 %v625_v53  ;;  %v444_v52 = vunpack.c.h.bf16 %v363_v48  ;;  %v446_v53 = vunpack.c.h.bf16 %v364_v49 }
  0xd7   : > { %687 = vmatprep.subr.mxu0 %v2087_v3  ;;  %912 = vmatprep.subr.mxu1 %v2087_v3 }
  0xd8   : > { %688 = vmatpush2.msra.mxu0 %v592_v54  ;;  %913 = vmatpush2.msra.mxu1 %v624_v55  ;;  %v365_v54 = vld [vmem:[%s2314_s18 + $0x90] sm:$0xff]  ;;  %v366_v55 = vld [vmem:[%s2314_s18 + $0x98] sm:$0xff] }
  0xd9   : > { %689 = vmatprep.subr.mxu0 %v2087_v3  ;;  %914 = vmatprep.subr.mxu1 %v2087_v3  ;;  %v447_v62 = vunpack.c.l.bf16 %v365_v54  ;;  %v449_v63 = vunpack.c.l.bf16 %v366_v55 }
  0xda   : > { %690 = vmatpush2.msra.mxu0 %v591_v56  ;;  %915 = vmatpush2.msra.mxu1 %v623_v57  ;;  %v443_v56 = vunpack.c.l.bf16 %v363_v48  ;;  %v445_v57 = vunpack.c.l.bf16 %v364_v49 }
  0xdb   : > { %691 = vmatprep.subr.mxu0 %v2087_v3  ;;  %916 = vmatprep.subr.mxu1 %v2087_v3 }
  0xdc   : > { %692 = vmatpush2.msra.mxu0 %v590_v58  ;;  %917 = vmatpush2.msra.mxu1 %v622_v59  ;;  %v448_v58 = vunpack.c.h.bf16 %v365_v54  ;;  %v450_v59 = vunpack.c.h.bf16 %v366_v55 }
  0xdd   : > { %693 = vmatprep.subr.mxu0 %v2087_v3  ;;  %918 = vmatprep.subr.mxu1 %v2087_v3 }
  0xde   : > { %694 = vmatpush2.msra.mxu0 %v589_v60  ;;  %919 = vmatpush2.msra.mxu1 %v621_v61  ;;  %v367_v60 = vld [vmem:[%s2314_s18 + $0xa0] sm:$0xff]  ;;  %v368_v61 = vld [vmem:[%s2314_s18 + $0xa8] sm:$0xff] }
  0xdf   : > { %695 = vmatprep.subr.mxu0 %v2087_v3  ;;  %920 = vmatprep.subr.mxu1 %v2087_v3  ;;  %v451_v5 = vunpack.c.l.bf16 %v367_v60 }
  0xe0   : > { %696 = vmatpush2.msra.mxu0 %v588_v0  ;;  %921 = vmatpush2.msra.mxu1 %v620_v1  ;;  %v452_v0 = vunpack.c.h.bf16 %v367_v60  ;;  %v454_v1 = vunpack.c.h.bf16 %v368_v61 }
  0xe1   : > { %697 = vmatprep.subr.mxu0 %v2087_v3  ;;  %922 = vmatprep.subr.mxu1 %v2087_v3  ;;  %v422_v3 = vunpack.c.h.bf16 %v352_v14 }
  0xe2   : > { %698 = vmatpush2.msra.mxu0 %v587_v6  ;;  %699 = vmatprep.mubr.f32.mxu0 %v412_v2  ;;  %v369_v2 = vld [vmem:[%s2314_s18 + $0xb0] sm:$0xff]  ;;  %v453_v6 = vunpack.c.l.bf16 %v368_v61 }
  0xe3   : > { %923 = vmatpush2.msra.mxu1 %v619_v9  ;;  %924 = vmatprep.mubr.f32.mxu1 %v414_v7  ;;  %v456_v7 = vunpack.c.h.bf16 %v369_v2  ;;  %v371_v9 = vld [vmem:[%s2314_s18 + $0xc0] sm:$0xff] }
  0xe4   : > { %700 = vmatmul.mubr.f32.vlgmr.msra.gmra.mxu0 %v411_v8  ;;  %925 = vmatmul.mubr.f32.vlgmr.msra.gmra.mxu1 %v413_v10  ;;  %v458_v8 = vunpack.c.h.bf16 %v370_v4  ;;  %v372_v10 = vld [vmem:[%s2314_s18 + $0xc8] sm:$0xff]  ;;  %v460_v13 = vunpack.c.h.bf16 %v371_v9 }
  0xe5   : > { %704 = vmatprep.mubr.f32.mxu0 %v416_v11  ;;  %929 = vmatprep.mubr.f32.mxu1 %v418_v12  ;;  %v455_v11 = vunpack.c.l.bf16 %v369_v2  ;;  %v457_v12 = vunpack.c.l.bf16 %v370_v4  ;;  %v462_v14 = vunpack.c.h.bf16 %v372_v10 }
  0xe8   : > { %705 = vmatmul.mubr.f32.gmra.mxu0 %v415_v15  ;;  %930 = vmatmul.mubr.f32.gmra.mxu1 %v417_v16  ;;  %v373_v15 = vld [vmem:[%s2314_s18 + $0xd0] sm:$0xff]  ;;  %v374_v16 = vld [vmem:[%s2314_s18 + $0xd8] sm:$0xff] }
  0xe9   : > { %709 = vmatprep.mubr.f32.mxu0 %v420_v17  ;;  %934 = vmatprep.mubr.f32.mxu1 %v422_v3  ;;  %v459_v17 = vunpack.c.l.bf16 %v371_v9  ;;  %v461_v3 = vunpack.c.l.bf16 %v372_v10  ;;  %v464_v18 = vunpack.c.h.bf16 %v373_v15  ;;  %v466_v19 = vunpack.c.h.bf16 %v374_v16 }
  0xec   : > { %710 = vmatmul.mubr.f32.gmra.mxu0 %v419_v20  ;;  %935 = vmatmul.mubr.f32.gmra.mxu1 %v421_v21  ;;  %v375_v20 = vld [vmem:[%s2314_s18 + $0xe0] sm:$0xff]  ;;  %v376_v21 = vld [vmem:[%s2314_s18 + $0xe8] sm:$0xff] }
  0xed   : > { %714 = vmatprep.mubr.f32.mxu0 %v424_v22  ;;  %939 = vmatprep.mubr.f32.mxu1 %v426_v23  ;;  %v463_v22 = vunpack.c.l.bf16 %v373_v15  ;;  %v465_v23 = vunpack.c.l.bf16 %v374_v16  ;;  %v468_v24 = vunpack.c.h.bf16 %v375_v20  ;;  %v470_v25 = vunpack.c.h.bf16 %v376_v21 }
  0xf0   : > { %715 = vmatmul.mubr.f32.gmra.mxu0 %v423_v26  ;;  %940 = vmatmul.mubr.f32.gmra.mxu1 %v425_v27  ;;  %v377_v26 = vld [vmem:[%s2314_s18 + $0xf0] sm:$0xff]  ;;  %v378_v27 = vld [vmem:[%s2314_s18 + $0xf8] sm:$0xff] }
  0xf1   : > { %719 = vmatprep.mubr.f32.mxu0 %v428_v28  ;;  %944 = vmatprep.mubr.f32.mxu1 %v430_v29  ;;  %v467_v28 = vunpack.c.l.bf16 %v375_v20  ;;  %v469_v29 = vunpack.c.l.bf16 %v376_v21  ;;  %v472_v30 = vunpack.c.h.bf16 %v377_v26  ;;  %v474_v31 = vunpack.c.h.bf16 %v378_v27 }
  0xf4   : > { %720 = vmatmul.mubr.f32.gmra.mxu0 %v427_v32  ;;  %945 = vmatmul.mubr.f32.gmra.mxu1 %v429_v33  ;;  %v379_v32 = vld [vmem:[%s2314_s18 + $0x100] sm:$0xff]  ;;  %v380_v33 = vld [vmem:[%s2314_s18 + $0x108] sm:$0xff] }
  0xf5   : > { %724 = vmatprep.mubr.f32.mxu0 %v432_v34  ;;  %949 = vmatprep.mubr.f32.mxu1 %v434_v35  ;;  %v471_v34 = vunpack.c.l.bf16 %v377_v26  ;;  %v473_v35 = vunpack.c.l.bf16 %v378_v27  ;;  %v476_v36 = vunpack.c.h.bf16 %v379_v32  ;;  %v478_v37 = vunpack.c.h.bf16 %v380_v33 }
  0xf8   : > { %725 = vmatmul.mubr.f32.gmra.mxu0 %v431_v38  ;;  %950 = vmatmul.mubr.f32.gmra.mxu1 %v433_v39  ;;  %v381_v38 = vld [vmem:[%s2314_s18 + $0x110] sm:$0xff]  ;;  %v382_v39 = vld [vmem:[%s2314_s18 + $0x118] sm:$0xff] }
  0xf9   : > { %729 = vmatprep.mubr.f32.mxu0 %v436_v40  ;;  %954 = vmatprep.mubr.f32.mxu1 %v438_v41  ;;  %v475_v40 = vunpack.c.l.bf16 %v379_v32  ;;  %v477_v41 = vunpack.c.l.bf16 %v380_v33  ;;  %v480_v42 = vunpack.c.h.bf16 %v381_v38  ;;  %v482_v43 = vunpack.c.h.bf16 %v382_v39 }
  0xfc   : > { %730 = vmatmul.mubr.f32.gmra.mxu0 %v435_v44  ;;  %955 = vmatmul.mubr.f32.gmra.mxu1 %v437_v45  ;;  %v383_v44 = vld [vmem:[%s2314_s18 + $0x120] sm:$0xff]  ;;  %v384_v45 = vld [vmem:[%s2314_s18 + $0x128] sm:$0xff] }
  0xfd   : > { %734 = vmatprep.mubr.f32.mxu0 %v440_v46  ;;  %959 = vmatprep.mubr.f32.mxu1 %v442_v47  ;;  %v479_v46 = vunpack.c.l.bf16 %v381_v38  ;;  %v481_v47 = vunpack.c.l.bf16 %v382_v39  ;;  %v484_v48 = vunpack.c.h.bf16 %v383_v44  ;;  %v486_v49 = vunpack.c.h.bf16 %v384_v45 }
 0x100   : > { %735 = vmatmul.mubr.f32.gmra.mxu0 %v439_v50  ;;  %960 = vmatmul.mubr.f32.gmra.mxu1 %v441_v51  ;;  %v385_v50 = vld [vmem:[%s2314_s18 + $0x130] sm:$0xff]  ;;  %v386_v51 = vld [vmem:[%s2314_s18 + $0x138] sm:$0xff] }
 0x101   : > { %739 = vmatprep.mubr.f32.mxu0 %v444_v52  ;;  %964 = vmatprep.mubr.f32.mxu1 %v446_v53  ;;  %v483_v52 = vunpack.c.l.bf16 %v383_v44  ;;  %v485_v53 = vunpack.c.l.bf16 %v384_v45  ;;  %v488_v54 = vunpack.c.h.bf16 %v385_v50  ;;  %v490_v55 = vunpack.c.h.bf16 %v386_v51 }
 0x104   : > { %740 = vmatmul.mubr.f32.gmra.mxu0 %v443_v56  ;;  %965 = vmatmul.mubr.f32.gmra.mxu1 %v445_v57  ;;  %v387_v56 = vld [vmem:[%s2314_s18 + $0x140] sm:$0xff]  ;;  %v388_v57 = vld [vmem:[%s2314_s18 + $0x148] sm:$0xff] }
 0x105   : > { %744 = vmatprep.mubr.f32.mxu0 %v448_v58  ;;  %969 = vmatprep.mubr.f32.mxu1 %v450_v59  ;;  %v487_v58 = vunpack.c.l.bf16 %v385_v50  ;;  %v489_v59 = vunpack.c.l.bf16 %v386_v51  ;;  %v492_v60 = vunpack.c.h.bf16 %v387_v56  ;;  %v494_v61 = vunpack.c.h.bf16 %v388_v57 }
 0x108   : > { %745 = vmatmul.mubr.f32.gmra.mxu0 %v447_v62  ;;  %970 = vmatmul.mubr.f32.gmra.mxu1 %v449_v63  ;;  %v389_v62 = vld [vmem:[%s2314_s18 + $0x150] sm:$0xff]  ;;  %v390_v63 = vld [vmem:[%s2314_s18 + $0x158] sm:$0xff] }
 0x109   : > { %749 = vmatprep.mubr.f32.mxu0 %v452_v0  ;;  %974 = vmatprep.mubr.f32.mxu1 %v454_v1  ;;  %v491_v0 = vunpack.c.l.bf16 %v387_v56  ;;  %v493_v1 = vunpack.c.l.bf16 %v388_v57  ;;  %v496_v2 = vunpack.c.h.bf16 %v389_v62  ;;  %v498_v4 = vunpack.c.h.bf16 %v390_v63 }
 0x10c   : > { %750 = vmatmul.mubr.f32.gmra.mxu0 %v451_v5  ;;  %975 = vmatmul.mubr.f32.gmra.mxu1 %v453_v6  ;;  %v391_v5 = vld [vmem:[%s2314_s18 + $0x160] sm:$0xff]  ;;  %v392_v6 = vld [vmem:[%s2314_s18 + $0x168] sm:$0xff] }
 0x10d   : > { %754 = vmatprep.mubr.f32.mxu0 %v456_v7  ;;  %979 = vmatprep.mubr.f32.mxu1 %v458_v8  ;;  %v495_v7 = vunpack.c.l.bf16 %v389_v62  ;;  %v497_v8 = vunpack.c.l.bf16 %v390_v63  ;;  %v500_v9 = vunpack.c.h.bf16 %v391_v5  ;;  %v502_v10 = vunpack.c.h.bf16 %v392_v6 }
 0x110   : > { %755 = vmatmul.mubr.f32.gmra.mxu0 %v455_v11  ;;  %980 = vmatmul.mubr.f32.gmra.mxu1 %v457_v12  ;;  %v393_v11 = vld [vmem:[%s2314_s18 + $0x170] sm:$0xff]  ;;  %v394_v12 = vld [vmem:[%s2314_s18 + $0x178] sm:$0xff] }
 0x111   : > { %759 = vmatprep.mubr.f32.mxu0 %v460_v13  ;;  %984 = vmatprep.mubr.f32.mxu1 %v462_v14  ;;  %v499_v13 = vunpack.c.l.bf16 %v391_v5  ;;  %v501_v14 = vunpack.c.l.bf16 %v392_v6  ;;  %v504_v15 = vunpack.c.h.bf16 %v393_v11  ;;  %v506_v16 = vunpack.c.h.bf16 %v394_v12 }
 0x114   : > { %760 = vmatmul.mubr.f32.gmra.mxu0 %v459_v17  ;;  %985 = vmatmul.mubr.f32.gmra.mxu1 %v461_v3  ;;  %v395_v17 = vld [vmem:[%s2314_s18 + $0x180] sm:$0xff]  ;;  %v396_v3 = vld [vmem:[%s2314_s18 + $0x188] sm:$0xff] }
 0x115   : > { %764 = vmatprep.mubr.f32.mxu0 %v464_v18  ;;  %989 = vmatprep.mubr.f32.mxu1 %v466_v19  ;;  %v503_v18 = vunpack.c.l.bf16 %v393_v11  ;;  %v505_v19 = vunpack.c.l.bf16 %v394_v12  ;;  %v508_v20 = vunpack.c.h.bf16 %v395_v17  ;;  %v510_v21 = vunpack.c.h.bf16 %v396_v3  ;;  %v540_v11 = vld [vmem:[#allocation2] sm:$0xff] }
 0x118   : > { %765 = vmatmul.mubr.f32.gmra.mxu0 %v463_v22  ;;  %990 = vmatmul.mubr.f32.gmra.mxu1 %v465_v23  ;;  %v397_v22 = vld [vmem:[%s2314_s18 + $0x190] sm:$0xff]  ;;  %v398_v23 = vld [vmem:[%s2314_s18 + $0x198] sm:$0xff] }
 0x119   : > { %769 = vmatprep.mubr.f32.mxu0 %v468_v24  ;;  %994 = vmatprep.mubr.f32.mxu1 %v470_v25  ;;  %v507_v24 = vunpack.c.l.bf16 %v395_v17  ;;  %v509_v25 = vunpack.c.l.bf16 %v396_v3  ;;  %v512_v26 = vunpack.c.h.bf16 %v397_v22  ;;  %v514_v27 = vunpack.c.h.bf16 %v398_v23  ;;  %v541_v3 = vld [vmem:[#allocation2 + $0xd8] sm:$0xff] }
 0x11c   : > { %770 = vmatmul.mubr.f32.gmra.mxu0 %v467_v28  ;;  %995 = vmatmul.mubr.f32.gmra.mxu1 %v469_v29  ;;  %v399_v28 = vld [vmem:[%s2314_s18 + $0x1a0] sm:$0xff]  ;;  %v400_v29 = vld [vmem:[%s2314_s18 + $0x1a8] sm:$0xff] }
 0x11d   : > { %774 = vmatprep.mubr.f32.mxu0 %v472_v30  ;;  %999 = vmatprep.mubr.f32.mxu1 %v474_v31  ;;  %v511_v30 = vunpack.c.l.bf16 %v397_v22  ;;  %v513_v31 = vunpack.c.l.bf16 %v398_v23  ;;  %v516_v32 = vunpack.c.h.bf16 %v399_v28  ;;  %v518_v33 = vunpack.c.h.bf16 %v400_v29 }
 0x120   : > { %775 = vmatmul.mubr.f32.gmra.mxu0 %v471_v34  ;;  %1000 = vmatmul.mubr.f32.gmra.mxu1 %v473_v35  ;;  %v401_v34 = vld [vmem:[%s2314_s18 + $0x1b0] sm:$0xff]  ;;  %v402_v35 = vld [vmem:[%s2314_s18 + $0x1b8] sm:$0xff] }
 0x121   : > { %779 = vmatprep.mubr.f32.mxu0 %v476_v36  ;;  %1004 = vmatprep.mubr.f32.mxu1 %v478_v37  ;;  %v515_v36 = vunpack.c.l.bf16 %v399_v28  ;;  %v517_v37 = vunpack.c.l.bf16 %v400_v29  ;;  %v520_v38 = vunpack.c.h.bf16 %v401_v34  ;;  %v522_v39 = vunpack.c.h.bf16 %v402_v35 }
 0x124   : > { %780 = vmatmul.mubr.f32.gmra.mxu0 %v475_v40  ;;  %1005 = vmatmul.mubr.f32.gmra.mxu1 %v477_v41  ;;  %v403_v40 = vld [vmem:[%s2314_s18 + $0x1c0] sm:$0xff]  ;;  %v404_v41 = vld [vmem:[%s2314_s18 + $0x1c8] sm:$0xff] }
 0x125   : > { %784 = vmatprep.mubr.f32.mxu0 %v480_v42  ;;  %1009 = vmatprep.mubr.f32.mxu1 %v482_v43  ;;  %v519_v42 = vunpack.c.l.bf16 %v401_v34  ;;  %v521_v43 = vunpack.c.l.bf16 %v402_v35  ;;  %v524_v44 = vunpack.c.h.bf16 %v403_v40  ;;  %v526_v45 = vunpack.c.h.bf16 %v404_v41 }
 0x128   : > { %785 = vmatmul.mubr.f32.gmra.mxu0 %v479_v46  ;;  %1010 = vmatmul.mubr.f32.gmra.mxu1 %v481_v47  ;;  %v405_v46 = vld [vmem:[%s2314_s18 + $0x1d0] sm:$0xff]  ;;  %v406_v47 = vld [vmem:[%s2314_s18 + $0x1d8] sm:$0xff] }
 0x129   : > { %789 = vmatprep.mubr.f32.mxu0 %v484_v48  ;;  %1014 = vmatprep.mubr.f32.mxu1 %v486_v49  ;;  %v523_v48 = vunpack.c.l.bf16 %v403_v40  ;;  %v525_v49 = vunpack.c.l.bf16 %v404_v41  ;;  %v528_v50 = vunpack.c.h.bf16 %v405_v46  ;;  %v530_v51 = vunpack.c.h.bf16 %v406_v47 }
 0x12c   : > { %790 = vmatmul.mubr.f32.gmra.mxu0 %v483_v52  ;;  %1015 = vmatmul.mubr.f32.gmra.mxu1 %v485_v53  ;;  %v407_v52 = vld [vmem:[%s2314_s18 + $0x1e0] sm:$0xff]  ;;  %v408_v53 = vld [vmem:[%s2314_s18 + $0x1e8] sm:$0xff] }
 0x12d   : > { %794 = vmatprep.mubr.f32.mxu0 %v488_v54  ;;  %1019 = vmatprep.mubr.f32.mxu1 %v490_v55  ;;  %v527_v54 = vunpack.c.l.bf16 %v405_v46  ;;  %v529_v55 = vunpack.c.l.bf16 %v406_v47  ;;  %v532_v56 = vunpack.c.h.bf16 %v407_v52  ;;  %v534_v57 = vunpack.c.h.bf16 %v408_v53 }
 0x130   : > { %795 = vmatmul.mubr.f32.gmra.mxu0 %v487_v58  ;;  %1020 = vmatmul.mubr.f32.gmra.mxu1 %v489_v59  ;;  %v409_v58 = vld [vmem:[%s2314_s18 + $0x1f0] sm:$0xff]  ;;  %v410_v59 = vld [vmem:[%s2314_s18 + $0x1f8] sm:$0xff]  ;;  %s2795_s18 = sld [smem:[#allocation18_spill]] }
 0x131   : > { %799 = vmatprep.mubr.f32.mxu0 %v492_v60  ;;  %1024 = vmatprep.mubr.f32.mxu1 %v494_v61  ;;  %v531_v60 = vunpack.c.l.bf16 %v407_v52  ;;  %v533_v61 = vunpack.c.l.bf16 %v408_v53  ;;  %v536_v62 = vunpack.c.h.bf16 %v409_v58  ;;  %v538_v63 = vunpack.c.h.bf16 %v410_v59  ;;  %v546_v52 = vld [vmem:[#allocation2 + $0x48] sm:$0xff] }
 0x134   : > { %800 = vmatmul.mubr.f32.gmra.mxu0 %v491_v0  ;;  %1025 = vmatmul.mubr.f32.gmra.mxu1 %v493_v1  ;;  %v535_v0 = vunpack.c.l.bf16 %v409_v58  ;;  %v537_v1 = vunpack.c.l.bf16 %v410_v59  ;;  %v547_v59 = vld [vmem:[#allocation2 + $0x80] sm:$0xff] }
 0x135   : > { %804 = vmatprep.mubr.f32.mxu0 %v496_v2  ;;  %1029 = vmatprep.mubr.f32.mxu1 %v498_v4  ;;  %v539_v4 = vld [vmem:[#allocation2 + $0xb0] sm:$0xff] }
 0x136   : > { %p1678_p8 = scmp.ne.s32.totalorder %s2795_s18, 1 }
 0x138   : > { %805 = vmatmul.mubr.f32.gmra.mxu0 %v495_v7  ;;  %1030 = vmatmul.mubr.f32.gmra.mxu1 %v497_v8 }
 0x139   : > { %809 = vmatprep.mubr.f32.mxu0 %v500_v9  ;;  %1034 = vmatprep.mubr.f32.mxu1 %v502_v10 }
 0x13c   : > { %810 = vmatmul.mubr.f32.gmra.mxu0 %v499_v13  ;;  %1035 = vmatmul.mubr.f32.gmra.mxu1 %v501_v14 }
 0x13d   : > { %814 = vmatprep.mubr.f32.mxu0 %v504_v15  ;;  %1039 = vmatprep.mubr.f32.mxu1 %v506_v16 }
 0x140   : > { %815 = vmatmul.mubr.f32.gmra.mxu0 %v503_v18  ;;  %1040 = vmatmul.mubr.f32.gmra.mxu1 %v505_v19 }
 0x141   : > { %819 = vmatprep.mubr.f32.mxu0 %v508_v20  ;;  %1044 = vmatprep.mubr.f32.mxu1 %v510_v21 }
 0x144   : > { %820 = vmatmul.mubr.f32.gmra.mxu0 %v507_v24  ;;  %1045 = vmatmul.mubr.f32.gmra.mxu1 %v509_v25  ;;  %v542_v24 = vld [vmem:[#allocation2 + $0x18] sm:$0xff] }
 0x145   : > { %824 = vmatprep.mubr.f32.mxu0 %v512_v26  ;;  %1049 = vmatprep.mubr.f32.mxu1 %v514_v27 }
 0x148   : > { %825 = vmatmul.mubr.f32.gmra.mxu0 %v511_v30  ;;  %1050 = vmatmul.mubr.f32.gmra.mxu1 %v513_v31  ;;  %v543_v31 = vld [vmem:[#allocation2 + $0x50] sm:$0xff] }
 0x149   : > { %829 = vmatprep.mubr.f32.mxu0 %v516_v32  ;;  %1054 = vmatprep.mubr.f32.mxu1 %v518_v33 }
 0x14c   : > { %830 = vmatmul.mubr.f32.gmra.mxu0 %v515_v36  ;;  %1055 = vmatmul.mubr.f32.gmra.mxu1 %v517_v37 }
 0x14d   : > { %834 = vmatprep.mubr.f32.mxu0 %v520_v38  ;;  %1059 = vmatprep.mubr.f32.mxu1 %v522_v39  ;;  %v544_v38 = vld [vmem:[#allocation2 + $0x68] sm:$0xff] }
 0x150   : > { %835 = vmatmul.mubr.f32.gmra.mxu0 %v519_v42  ;;  %1060 = vmatmul.mubr.f32.gmra.mxu1 %v521_v43 }
 0x151   : > { %839 = vmatprep.mubr.f32.mxu0 %v524_v44  ;;  %1064 = vmatprep.mubr.f32.mxu1 %v526_v45  ;;  %v545_v45 = vld [vmem:[#allocation2 + $0x30] sm:$0xff] }
 0x154   : > { %840 = vmatmul.mubr.f32.gmra.mxu0 %v523_v48  ;;  %1065 = vmatmul.mubr.f32.gmra.mxu1 %v525_v49 }
 0x155   : > { %844 = vmatprep.mubr.f32.mxu0 %v528_v50  ;;  %1069 = vmatprep.mubr.f32.mxu1 %v530_v51 }
 0x158   : > { %845 = vmatmul.mubr.f32.gmra.mxu0 %v527_v54  ;;  %1070 = vmatmul.mubr.f32.gmra.mxu1 %v529_v55 }
 0x159   : > { %849 = vmatprep.mubr.f32.mxu0 %v532_v56  ;;  %1074 = vmatprep.mubr.f32.mxu1 %v534_v57 }
 0x15c   : > { %850 = vmatmul.mubr.f32.gmra.mxu0 %v531_v60  ;;  %1075 = vmatmul.mubr.f32.gmra.mxu1 %v533_v61 }
 0x15d   : > { %854 = vmatprep.mubr.f32.mxu0 %v536_v62  ;;  %1079 = vmatprep.mubr.f32.mxu1 %v538_v63 }
 0x160   : > { %855 = vmatmul.mubr.f32.gmra.mxu0 %v535_v0  ;;  %1080 = vmatmul.mubr.f32.gmra.mxu1 %v537_v1 }
 0x1a4   : > { %v701_v2 = vpop.f32.mrf.mxu0  ;;  %v926_v5 = vpop.f32.mrf.mxu1 }
 0x1a5   : > { %v927_v6 = vadd.f32 %v926_v5, %v701_v2  ;;  %v548_v2 = vld [vmem:[#allocation2 + $0x88] sm:$0xff] }
 0x1a6   : > { %v703_v7 = vpop.f32.mrf.mxu0  ;;  %v928_v8 = vpop.f32.mrf.mxu1 }
 0x1a7   : > { %v1085_v9 = vadd.f32 %v927_v6, %v539_v4 }
 0x1a8   : > { %v706_v10 = vpop.f32.mrf.mxu0  ;;  %v931_v12 = vpop.f32.mrf.mxu1 }
 0x1a9   : > { %1117 = vst [vmem:[#allocation2 + $0xb0] sm:$0xff] %v1085_v9  ;;  %v932_v13 = vadd.f32 %v931_v12, %v706_v10  ;;  %v549_v10 = vld [vmem:[#allocation2 + $0xe8] sm:$0xff] }
 0x1aa   : > { %v708_v14 = vpop.f32.mrf.mxu0  ;;  %v933_v15 = vpop.f32.mrf.mxu1 }
 0x1ab   : > { %v1086_v16 = vadd.f32 %v932_v13, %v540_v11 }
 0x1ac   : > { %v711_v17 = vpop.f32.mrf.mxu0  ;;  %v936_v18 = vpop.f32.mrf.mxu1 }
 0x1ad   : > { %1118 = vst [vmem:[#allocation2] sm:$0xff] %v1086_v16  ;;  %v937_v19 = vadd.f32 %v936_v18, %v711_v17  ;;  %v550_v17 = vld [vmem:[#allocation2 + $0xb8] sm:$0xff] }
 0x1ae   : > { %v713_v20 = vpop.f32.mrf.mxu0  ;;  %v938_v21 = vpop.f32.mrf.mxu1 }
 0x1af   : > { %v1087_v22 = vadd.f32 %v937_v19, %v541_v3 }
 0x1b0   : > { %v716_v23 = vpop.f32.mrf.mxu0  ;;  %v941_v25 = vpop.f32.mrf.mxu1 }
 0x1b1   : > { %1119 = vst [vmem:[#allocation2 + $0xd8] sm:$0xff] %v1087_v22  ;;  %v942_v26 = vadd.f32 %v941_v25, %v716_v23  ;;  %v551_v23 = vld [vmem:[#allocation2 + $0x60] sm:$0xff] }
 0x1b2   : > { %v718_v27 = vpop.f32.mrf.mxu0  ;;  %v943_v28 = vpop.f32.mrf.mxu1 }
 0x1b3   : > { %v1088_v29 = vadd.f32 %v942_v26, %v542_v24 }
 0x1b4   : > { %v721_v30 = vpop.f32.mrf.mxu0  ;;  %v946_v32 = vpop.f32.mrf.mxu1 }
 0x1b5   : > { %1120 = vst [vmem:[#allocation2 + $0x18] sm:$0xff] %v1088_v29  ;;  %v947_v33 = vadd.f32 %v946_v32, %v721_v30  ;;  %v552_v30 = vld [vmem:[#allocation2 + $0xf0] sm:$0xff] }
 0x1b6   : > { %v723_v34 = vpop.f32.mrf.mxu0  ;;  %v948_v35 = vpop.f32.mrf.mxu1 }
 0x1b7   : > { %v1089_v36 = vadd.f32 %v947_v33, %v543_v31 }
 0x1b8   : > { %v726_v37 = vpop.f32.mrf.mxu0  ;;  %v951_v39 = vpop.f32.mrf.mxu1 }
 0x1b9   : > { %1121 = vst [vmem:[#allocation2 + $0x50] sm:$0xff] %v1089_v36  ;;  %v952_v40 = vadd.f32 %v951_v39, %v726_v37  ;;  %v553_v37 = vld [vmem:[#allocation2 + $0x8] sm:$0xff] }
 0x1ba   : > { %v728_v41 = vpop.f32.mrf.mxu0  ;;  %v953_v42 = vpop.f32.mrf.mxu1 }
 0x1bb   : > { %v1090_v43 = vadd.f32 %v952_v40, %v544_v38 }
 0x1bc   : > { %v731_v44 = vpop.f32.mrf.mxu0  ;;  %v956_v46 = vpop.f32.mrf.mxu1 }
 0x1bd   : > { %1122 = vst [vmem:[#allocation2 + $0x68] sm:$0xff] %v1090_v43  ;;  %v957_v47 = vadd.f32 %v956_v46, %v731_v44  ;;  %v554_v44 = vld [vmem:[#allocation2 + $0x78] sm:$0xff] }
 0x1be   : > { %v733_v48 = vpop.f32.mrf.mxu0  ;;  %v958_v49 = vpop.f32.mrf.mxu1 }
 0x1bf   : > { %v1091_v50 = vadd.f32 %v957_v47, %v545_v45 }
 0x1c0   : > { %v736_v51 = vpop.f32.mrf.mxu0  ;;  %v961_v53 = vpop.f32.mrf.mxu1 }
 0x1c1   : > { %1123 = vst [vmem:[#allocation2 + $0x30] sm:$0xff] %v1091_v50  ;;  %v962_v54 = vadd.f32 %v961_v53, %v736_v51  ;;  %v555_v51 = vld [vmem:[#allocation2 + $0x38] sm:$0xff] }
 0x1c2   : > { %v738_v55 = vpop.f32.mrf.mxu0  ;;  %v963_v56 = vpop.f32.mrf.mxu1 }
 0x1c3   : > { %v1092_v57 = vadd.f32 %v962_v54, %v546_v52 }
 0x1c4   : > { %v741_v58 = vpop.f32.mrf.mxu0  ;;  %v966_v60 = vpop.f32.mrf.mxu1 }
 0x1c5   : > { %1124 = vst [vmem:[#allocation2 + $0x48] sm:$0xff] %v1092_v57  ;;  %v967_v61 = vadd.f32 %v966_v60, %v741_v58  ;;  %v556_v58 = vld [vmem:[#allocation2 + $0x58] sm:$0xff] }
 0x1c6   : > { %v743_v62 = vpop.f32.mrf.mxu0  ;;  %v968_v63 = vpop.f32.mrf.mxu1 }
 0x1c7   : > { %v1093_v0 = vadd.f32 %v967_v61, %v547_v59 }
 0x1c8   : > { %v746_v1 = vpop.f32.mrf.mxu0  ;;  %v971_v4 = vpop.f32.mrf.mxu1 }
 0x1c9   : > { %1125 = vst [vmem:[#allocation2 + $0x80] sm:$0xff] %v1093_v0  ;;  %v972_v5 = vadd.f32 %v971_v4, %v746_v1  ;;  %v557_v1 = vld [vmem:[#allocation2 + $0x40] sm:$0xff] }
 0x1ca   : > { %v748_v6 = vpop.f32.mrf.mxu0  ;;  %v973_v7 = vpop.f32.mrf.mxu1 }
 0x1cb   : > { %v1094_v8 = vadd.f32 %v972_v5, %v548_v2 }
 0x1cc   : > { %v751_v9 = vpop.f32.mrf.mxu0  ;;  %v976_v11 = vpop.f32.mrf.mxu1 }
 0x1cd   : > { %1126 = vst [vmem:[#allocation2 + $0x88] sm:$0xff] %v1094_v8  ;;  %v977_v12 = vadd.f32 %v976_v11, %v751_v9  ;;  %v558_v9 = vld [vmem:[#allocation2 + $0xc8] sm:$0xff] }
 0x1ce   : > { %v753_v13 = vpop.f32.mrf.mxu0  ;;  %v978_v14 = vpop.f32.mrf.mxu1 }
 0x1cf   : > { %v1095_v15 = vadd.f32 %v977_v12, %v549_v10 }
 0x1d0   : > { %v756_v16 = vpop.f32.mrf.mxu0  ;;  %v981_v3 = vpop.f32.mrf.mxu1 }
 0x1d1   : > { %1127 = vst [vmem:[#allocation2 + $0xe8] sm:$0xff] %v1095_v15  ;;  %v982_v18 = vadd.f32 %v981_v3, %v756_v16  ;;  %v559_v16 = vld [vmem:[#allocation2 + $0xe0] sm:$0xff] }
 0x1d2   : > { %v758_v19 = vpop.f32.mrf.mxu0  ;;  %v983_v20 = vpop.f32.mrf.mxu1 }
 0x1d3   : > { %v1096_v21 = vadd.f32 %v982_v18, %v550_v17 }
 0x1d4   : > { %v761_v22 = vpop.f32.mrf.mxu0  ;;  %v986_v24 = vpop.f32.mrf.mxu1 }
 0x1d5   : > { %1128 = vst [vmem:[#allocation2 + $0xb8] sm:$0xff] %v1096_v21  ;;  %v987_v25 = vadd.f32 %v986_v24, %v761_v22  ;;  %v560_v22 = vld [vmem:[#allocation2 + $0x90] sm:$0xff] }
 0x1d6   : > { %v763_v26 = vpop.f32.mrf.mxu0  ;;  %v988_v27 = vpop.f32.mrf.mxu1 }
 0x1d7   : > { %v1097_v28 = vadd.f32 %v987_v25, %v551_v23 }
 0x1d8   : > { %v766_v29 = vpop.f32.mrf.mxu0  ;;  %v991_v31 = vpop.f32.mrf.mxu1 }
 0x1d9   : > { %1129 = vst [vmem:[#allocation2 + $0x60] sm:$0xff] %v1097_v28  ;;  %v992_v32 = vadd.f32 %v991_v31, %v766_v29  ;;  %v561_v29 = vld [vmem:[#allocation2 + $0x70] sm:$0xff] }
 0x1da   : > { %v768_v33 = vpop.f32.mrf.mxu0  ;;  %v993_v34 = vpop.f32.mrf.mxu1 }
 0x1db   : > { %v1098_v35 = vadd.f32 %v992_v32, %v552_v30 }
 0x1dc   : > { %v771_v36 = vpop.f32.mrf.mxu0  ;;  %v996_v38 = vpop.f32.mrf.mxu1 }
 0x1dd   : > { %1130 = vst [vmem:[#allocation2 + $0xf0] sm:$0xff] %v1098_v35  ;;  %v997_v39 = vadd.f32 %v996_v38, %v771_v36  ;;  %v562_v36 = vld [vmem:[#allocation2 + $0xc0] sm:$0xff] }
 0x1de   : > { %v773_v40 = vpop.f32.mrf.mxu0  ;;  %v998_v41 = vpop.f32.mrf.mxu1 }
 0x1df   : > { %v1099_v42 = vadd.f32 %v997_v39, %v553_v37 }
 0x1e0   : > { %v776_v43 = vpop.f32.mrf.mxu0  ;;  %v1001_v45 = vpop.f32.mrf.mxu1 }
 0x1e1   : > { %1131 = vst [vmem:[#allocation2 + $0x8] sm:$0xff] %v1099_v42  ;;  %v1002_v46 = vadd.f32 %v1001_v45, %v776_v43  ;;  %v563_v43 = vld [vmem:[#allocation2 + $0xa8] sm:$0xff] }
 0x1e2   : > { %v778_v47 = vpop.f32.mrf.mxu0  ;;  %v1003_v48 = vpop.f32.mrf.mxu1 }
 0x1e3   : > { %v1100_v49 = vadd.f32 %v1002_v46, %v554_v44 }
 0x1e4   : > { %v781_v50 = vpop.f32.mrf.mxu0  ;;  %v1006_v52 = vpop.f32.mrf.mxu1 }
 0x1e5   : > { %1132 = vst [vmem:[#allocation2 + $0x78] sm:$0xff] %v1100_v49  ;;  %v1007_v53 = vadd.f32 %v1006_v52, %v781_v50  ;;  %v564_v50 = vld [vmem:[#allocation2 + $0xd0] sm:$0xff] }
 0x1e6   : > { %v783_v54 = vpop.f32.mrf.mxu0  ;;  %v1008_v55 = vpop.f32.mrf.mxu1 }
 0x1e7   : > { %v1101_v56 = vadd.f32 %v1007_v53, %v555_v51 }
 0x1e8   : > { %v786_v57 = vpop.f32.mrf.mxu0  ;;  %v1011_v59 = vpop.f32.mrf.mxu1 }
 0x1e9   : > { %1133 = vst [vmem:[#allocation2 + $0x38] sm:$0xff] %v1101_v56  ;;  %v1012_v60 = vadd.f32 %v1011_v59, %v786_v57  ;;  %v565_v57 = vld [vmem:[#allocation2 + $0x10] sm:$0xff] }
 0x1ea   : > { %v788_v61 = vpop.f32.mrf.mxu0  ;;  %v1013_v62 = vpop.f32.mrf.mxu1 }
 0x1eb   : > { %v1102_v63 = vadd.f32 %v1012_v60, %v556_v58 }
 0x1ec   : > { %v791_v0 = vpop.f32.mrf.mxu0  ;;  %v1016_v2 = vpop.f32.mrf.mxu1 }
 0x1ed   : > { %1134 = vst [vmem:[#allocation2 + $0x58] sm:$0xff] %v1102_v63  ;;  %v1017_v4 = vadd.f32 %v1016_v2, %v791_v0  ;;  %v566_v0 = vld [vmem:[#allocation2 + $0x28] sm:$0xff] }
 0x1ee   : > { %v793_v5 = vpop.f32.mrf.mxu0  ;;  %v1018_v6 = vpop.f32.mrf.mxu1 }
 0x1ef   : > { %v1103_v7 = vadd.f32 %v1017_v4, %v557_v1 }
 0x1f0   : > { %v796_v8 = vpop.f32.mrf.mxu0  ;;  %v1021_v10 = vpop.f32.mrf.mxu1 }
 0x1f1   : > { %1135 = vst [vmem:[#allocation2 + $0x40] sm:$0xff] %v1103_v7  ;;  %v1022_v11 = vadd.f32 %v1021_v10, %v796_v8  ;;  %v567_v8 = vld [vmem:[#allocation2 + $0xa0] sm:$0xff] }
 0x1f2   : > { %v798_v12 = vpop.f32.mrf.mxu0  ;;  %v1023_v13 = vpop.f32.mrf.mxu1 }
 0x1f3   : > { %v1104_v14 = vadd.f32 %v1022_v11, %v558_v9 }
 0x1f4   : > { %v801_v15 = vpop.f32.mrf.mxu0  ;;  %v1026_v17 = vpop.f32.mrf.mxu1 }
 0x1f5   : > { %1136 = vst [vmem:[#allocation2 + $0xc8] sm:$0xff] %v1104_v14  ;;  %v1027_v3 = vadd.f32 %v1026_v17, %v801_v15  ;;  %v568_v15 = vld [vmem:[#allocation2 + $0xf8] sm:$0xff] }
 0x1f6   : > { %v803_v18 = vpop.f32.mrf.mxu0  ;;  %v1028_v19 = vpop.f32.mrf.mxu1 }
 0x1f7   : > { %v1105_v20 = vadd.f32 %v1027_v3, %v559_v16 }
 0x1f8   : > { %v806_v21 = vpop.f32.mrf.mxu0  ;;  %v1031_v23 = vpop.f32.mrf.mxu1 }
 0x1f9   : > { %1137 = vst [vmem:[#allocation2 + $0xe0] sm:$0xff] %v1105_v20  ;;  %v1032_v24 = vadd.f32 %v1031_v23, %v806_v21  ;;  %v569_v21 = vld [vmem:[#allocation2 + $0x20] sm:$0xff] }
 0x1fa   : > { %v808_v25 = vpop.f32.mrf.mxu0  ;;  %v1033_v26 = vpop.f32.mrf.mxu1 }
 0x1fb   : > { %v1106_v27 = vadd.f32 %v1032_v24, %v560_v22 }
 0x1fc   : > { %v811_v28 = vpop.f32.mrf.mxu0  ;;  %v1036_v30 = vpop.f32.mrf.mxu1 }
 0x1fd   : > { %1138 = vst [vmem:[#allocation2 + $0x90] sm:$0xff] %v1106_v27  ;;  %v1037_v31 = vadd.f32 %v1036_v30, %v811_v28  ;;  %v570_v28 = vld [vmem:[#allocation2 + $0x98] sm:$0xff] }
 0x1fe   : > { %v813_v32 = vpop.f32.mrf.mxu0  ;;  %v1038_v33 = vpop.f32.mrf.mxu1 }
 0x1ff   : > { %v1107_v34 = vadd.f32 %v1037_v31, %v561_v29 }
 0x200   : > { %v816_v35 = vpop.f32.mrf.mxu0  ;;  %v1041_v37 = vpop.f32.mrf.mxu1 }
 0x201   : > { %1139 = vst [vmem:[#allocation2 + $0x70] sm:$0xff] %v1107_v34  ;;  %v1042_v38 = vadd.f32 %v1041_v37, %v816_v35 }
 0x202   : > { %v818_v39 = vpop.f32.mrf.mxu0  ;;  %v1043_v40 = vpop.f32.mrf.mxu1 }
 0x203   : > { %v1108_v41 = vadd.f32 %v1042_v38, %v562_v36 }
 0x204   : > { %v821_v42 = vpop.f32.mrf.mxu0  ;;  %v1046_v44 = vpop.f32.mrf.mxu1 }
 0x205   : > { %1140 = vst [vmem:[#allocation2 + $0xc0] sm:$0xff] %v1108_v41  ;;  %v1047_v45 = vadd.f32 %v1046_v44, %v821_v42 }
 0x206   : > { %v823_v46 = vpop.f32.mrf.mxu0  ;;  %v1048_v47 = vpop.f32.mrf.mxu1 }
 0x207   : > { %v1109_v48 = vadd.f32 %v1047_v45, %v563_v43 }
 0x208   : > { %v826_v49 = vpop.f32.mrf.mxu0  ;;  %v1051_v51 = vpop.f32.mrf.mxu1 }
 0x209   : > { %1141 = vst [vmem:[#allocation2 + $0xa8] sm:$0xff] %v1109_v48  ;;  %v1052_v52 = vadd.f32 %v1051_v51, %v826_v49 }
 0x20a   : > { %v828_v53 = vpop.f32.mrf.mxu0  ;;  %v1053_v54 = vpop.f32.mrf.mxu1 }
 0x20b   : > { %v1110_v55 = vadd.f32 %v1052_v52, %v564_v50 }
 0x20c   : > { %v831_v56 = vpop.f32.mrf.mxu0  ;;  %v1056_v58 = vpop.f32.mrf.mxu1 }
 0x20d   : > { %1142 = vst [vmem:[#allocation2 + $0xd0] sm:$0xff] %v1110_v55  ;;  %v1057_v59 = vadd.f32 %v1056_v58, %v831_v56 }
 0x20e   : > { %v833_v60 = vpop.f32.mrf.mxu0  ;;  %v1058_v61 = vpop.f32.mrf.mxu1 }
 0x20f   : > { %v1111_v62 = vadd.f32 %v1057_v59, %v565_v57 }
 0x210   : > { %v836_v63 = vpop.f32.mrf.mxu0  ;;  %v1061_v1 = vpop.f32.mrf.mxu1 }
 0x211   : > { %1143 = vst [vmem:[#allocation2 + $0x10] sm:$0xff] %v1111_v62  ;;  %v1062_v2 = vadd.f32 %v1061_v1, %v836_v63 }
 0x212   : > { %v838_v4 = vpop.f32.mrf.mxu0  ;;  %v1063_v5 = vpop.f32.mrf.mxu1 }
 0x213   : > { %v1112_v6 = vadd.f32 %v1062_v2, %v566_v0 }
 0x214   : > { %v841_v7 = vpop.f32.mrf.mxu0  ;;  %v1066_v9 = vpop.f32.mrf.mxu1 }
 0x215   : > { %1144 = vst [vmem:[#allocation2 + $0x28] sm:$0xff] %v1112_v6  ;;  %v1067_v10 = vadd.f32 %v1066_v9, %v841_v7 }
 0x216   : > { %v843_v11 = vpop.f32.mrf.mxu0  ;;  %v1068_v12 = vpop.f32.mrf.mxu1 }
 0x217   : > { %v1113_v13 = vadd.f32 %v1067_v10, %v567_v8 }
 0x218   : > { %v846_v14 = vpop.f32.mrf.mxu0  ;;  %v1071_v16 = vpop.f32.mrf.mxu1 }
 0x219   : > { %1145 = vst [vmem:[#allocation2 + $0xa0] sm:$0xff] %v1113_v13  ;;  %v1072_v17 = vadd.f32 %v1071_v16, %v846_v14 }
 0x21a   : > { %v848_v3 = vpop.f32.mrf.mxu0  ;;  %v1073_v18 = vpop.f32.mrf.mxu1 }
 0x21b   : > { %v1114_v19 = vadd.f32 %v1072_v17, %v568_v15 }
 0x21c   : > { %v851_v20 = vpop.f32.mrf.mxu0  ;;  %v1076_v22 = vpop.f32.mrf.mxu1 }
 0x21d   : > { %1146 = vst [vmem:[#allocation2 + $0xf8] sm:$0xff] %v1114_v19  ;;  %v1077_v23 = vadd.f32 %v1076_v22, %v851_v20 }
 0x21e   : > { %v853_v24 = vpop.f32.mrf.mxu0  ;;  %v1078_v25 = vpop.f32.mrf.mxu1 }
 0x21f   : > { %v1115_v26 = vadd.f32 %v1077_v23, %v569_v21 }
 0x220   : > { %v856_v27 = vpop.f32.mrf.mxu0  ;;  %v1081_v29 = vpop.f32.mrf.mxu1 }
 0x221   : > { %1147 = vst [vmem:[#allocation2 + $0x20] sm:$0xff] %v1115_v26  ;;  %v1082_v30 = vadd.f32 %v1081_v29, %v856_v27  ;;  %1152 = sbr.rel (%p1678_p8) target bundleno = 743 (0x2e7), region = 56 }
 0x222   : > { %v858_v31 = vpop.f32.mrf.mxu0  ;;  %v1083_v32 = vpop.f32.mrf.mxu1 }
 0x223   : > { %v1116_v33 = vadd.f32 %v1082_v30, %v570_v28 }
 0x225   : > { %1148 = vst [vmem:[#allocation2 + $0x98] sm:$0xff] %v1116_v33 }
 0x226   : > { %v1187_v34 = vld [vmem:[%s2339_s16 + $0x10] sm:$0xff]  ;;  %v1185_v35 = vld [vmem:[%s2339_s16] sm:$0xff]  ;;  %v2088_v36 = vmov 0   ;;  %v1188_v37 = vld [vmem:[%s2339_s16 + $0x18] sm:$0xff] }
 0x227   : > { %1841 = vset.pattern.permute.xlu1 %v2088_v36  ;;  %1840 = vset.pattern.permute.xlu0 %v2088_v36  ;;  %v1186_v38 = vld [vmem:[%s2339_s16 + $0x8] sm:$0xff]  ;;  %v1189_v40 = vld [vmem:[%s2339_s16 + $0x20] sm:$0xff]  ;;  %v1192_v41 = vld [vmem:[%s2339_s16 + $0x38] sm:$0xff] }
 0x228   : > { %1229 = vperm.xlu1 %1841, %v1187_v34   ;;  %1219 = vperm.xlu0 %1840, %v1185_v35   ;;  %v1190_v39 = vld [vmem:[%s2339_s16 + $0x28] sm:$0xff]  ;;  %v1191_v42 = vld [vmem:[%s2339_s16 + $0x30] sm:$0xff]  ;;  %v1193_v44 = vld [vmem:[%s2339_s16 + $0x40] sm:$0xff] }
 0x229   : > { %v1194_v43 = vld [vmem:[%s2339_s16 + $0x48] sm:$0xff]  ;;  %v1196_v45 = vld [vmem:[%s2339_s16 + $0x58] sm:$0xff]  ;;  %v1195_v46 = vld [vmem:[%s2339_s16 + $0x50] sm:$0xff] }
 0x22a   : > { %v1198_v47 = vld [vmem:[%s2339_s16 + $0x68] sm:$0xff]  ;;  %v1197_v48 = vld [vmem:[%s2339_s16 + $0x60] sm:$0xff]  ;;  %v1200_v49 = vld [vmem:[%s2339_s16 + $0x78] sm:$0xff] }
 0x22b   : > { %v1199_v50 = vld [vmem:[%s2339_s16 + $0x70] sm:$0xff]  ;;  %v1202_v51 = vld [vmem:[%s2339_s16 + $0x88] sm:$0xff]  ;;  %v1201_v52 = vld [vmem:[%s2339_s16 + $0x80] sm:$0xff] }
 0x22c   : > { %1234 = vperm.xlu1 %1841, %v1188_v37   ;;  %1224 = vperm.xlu0 %1840, %v1186_v38   ;;  %v1204_v53 = vld [vmem:[%s2339_s16 + $0x98] sm:$0xff]  ;;  %v1203_v54 = vld [vmem:[%s2339_s16 + $0x90] sm:$0xff]  ;;  %v1206_v55 = vld [vmem:[%s2339_s16 + $0xa8] sm:$0xff] }
 0x22d   : > { %v1205_v56 = vld [vmem:[%s2339_s16 + $0xa0] sm:$0xff]  ;;  %v1208_v57 = vld [vmem:[%s2339_s16 + $0xb8] sm:$0xff]  ;;  %v1207_v58 = vld [vmem:[%s2339_s16 + $0xb0] sm:$0xff] }
 0x22e   : > { %v1210_v59 = vld [vmem:[%s2339_s16 + $0xc8] sm:$0xff]  ;;  %v1209_v60 = vld [vmem:[%s2339_s16 + $0xc0] sm:$0xff]  ;;  %v1212_v61 = vld [vmem:[%s2339_s16 + $0xd8] sm:$0xff] }
 0x22f   : > { %v1211_v62 = vld [vmem:[%s2339_s16 + $0xd0] sm:$0xff]  ;;  %v1214_v63 = vld [vmem:[%s2339_s16 + $0xe8] sm:$0xff]  ;;  %v1213_v0 = vld [vmem:[%s2339_s16 + $0xe0] sm:$0xff] }
 0x230   : > { %1244 = vperm.xlu1 %1841, %v1190_v39   ;;  %1239 = vperm.xlu0 %1840, %v1189_v40   ;;  %v1216_v1 = vld [vmem:[%s2339_s16 + $0xf8] sm:$0xff]  ;;  %v1215_v2 = vld [vmem:[%s2339_s16 + $0xf0] sm:$0xff]  ;;  %v2569_v6 = vld [vmem:[#allocation8] ss:$0 sm:$0xff] }
 0x231   : > { %v1155_v4 = vld [vmem:[#allocation2 + $0xd8] sm:$0xff]  ;;  %v1153_v5 = vld [vmem:[#allocation2 + $0xb0] sm:$0xff]  ;;  %v1154_v12 = vld [vmem:[#allocation2] sm:$0xff] }
 0x232   : > { %v1156_v11 = vld [vmem:[#allocation2 + $0x18] sm:$0xff]  ;;  %v1158_v20 = vld [vmem:[#allocation2 + $0x68] sm:$0xff]  ;;  %v1157_v21 = vld [vmem:[#allocation2 + $0x50] sm:$0xff] }
 0x233   : > { %v1160_v30 = vld [vmem:[#allocation2 + $0x48] sm:$0xff]  ;;  %v1159_v31 = vld [vmem:[#allocation2 + $0x30] sm:$0xff] }
 0x234   : > { %1254 = vperm.xlu1 %1841, %v1192_v41   ;;  %1249 = vperm.xlu0 %1840, %v1191_v42   ;;  %v1162_v40 = vld [vmem:[#allocation2 + $0x88] sm:$0xff]  ;;  %v1161_v41 = vld [vmem:[#allocation2 + $0x80] sm:$0xff] }
 0x238   : > { %1264 = vperm.xlu1 %1841, %v1194_v43   ;;  %1259 = vperm.xlu0 %1840, %v1193_v44  }
 0x23c   : > { %1274 = vperm.xlu1 %1841, %v1196_v45   ;;  %1269 = vperm.xlu0 %1840, %v1195_v46  }
 0x240   : > { %1284 = vperm.xlu1 %1841, %v1198_v47   ;;  %1279 = vperm.xlu0 %1840, %v1197_v48  }
 0x244   : > { %1294 = vperm.xlu1 %1841, %v1200_v49   ;;  %1289 = vperm.xlu0 %1840, %v1199_v50   ;;  %v1164_v50 = vld [vmem:[#allocation2 + $0xb8] sm:$0xff] }
 0x248   : > { %1304 = vperm.xlu1 %1841, %v1202_v51   ;;  %1299 = vperm.xlu0 %1840, %v1201_v52   ;;  %v1163_v51 = vld [vmem:[#allocation2 + $0xe8] sm:$0xff] }
 0x24c   : > { %1314 = vperm.xlu1 %1841, %v1204_v53   ;;  %1309 = vperm.xlu0 %1840, %v1203_v54  }
 0x250   : > { %1324 = vperm.xlu1 %1841, %v1206_v55   ;;  %1319 = vperm.xlu0 %1840, %v1205_v56  }
 0x254   : > { %1334 = vperm.xlu1 %1841, %v1208_v57   ;;  %1329 = vperm.xlu0 %1840, %v1207_v58  }
 0x258   : > { %1344 = vperm.xlu1 %1841, %v1210_v59   ;;  %1339 = vperm.xlu0 %1840, %v1209_v60   ;;  %v1166_v60 = vld [vmem:[#allocation2 + $0xf0] sm:$0xff] }
 0x25c   : > { %1354 = vperm.xlu1 %1841, %v1212_v61   ;;  %1349 = vperm.xlu0 %1840, %v1211_v62   ;;  %v1165_v61 = vld [vmem:[#allocation2 + $0x60] sm:$0xff] }
 0x260   : > { %1364 = vperm.xlu1 %1841, %v1214_v63   ;;  %1359 = vperm.xlu0 %1840, %v1213_v0  }
 0x264   : > { %1374 = vperm.xlu1 %1841, %v1216_v1   ;;  %1369 = vperm.xlu0 %1840, %v1215_v2  }
 0x2a3   : > { %v1230_v7 = vpop.permute.xlu1 %1229  ;;  %v1220_v8 = vpop.permute.xlu0 %1219 }
 0x2a4   : > { %v1379_v9 = vmul.f32 %v1230_v7, %v1155_v4  ;;  %v1377_v10 = vmul.f32 %v1220_v8, %v1153_v5  ;;  %v1168_v8 = vld [vmem:[#allocation2 + $0x78] sm:$0xff] }
 0x2a6   : > { %v1418_v13 = vadd.f32 %v2569_v6, %v1379_v9  ;;  %v1416_v14 = vadd.f32 %v2569_v6, %v1377_v10  ;;  %v1167_v9 = vld [vmem:[#allocation2 + $0x8] sm:$0xff] }
 0x2a7   : > { %v1235_v15 = vpop.permute.xlu1 %1234  ;;  %v1225_v16 = vpop.permute.xlu0 %1224 }
 0x2a8   : > { %v1450_v17 = vmax.f32 %v1418_v13, 0.0  ;;  %v1448_v3 = vmax.f32 %v1416_v14, 0.0  ;;  %v1380_v18 = vmul.f32 %v1235_v15, %v1156_v11  ;;  %v1378_v19 = vmul.f32 %v1225_v16, %v1154_v12 }
 0x2aa   : > { %1482 = vst [vmem:[%s2341_s6 + $0x10] sm:$0xff] %v1450_v17  ;;  %1480 = vst [vmem:[%s2341_s6] sm:$0xff] %v1448_v3  ;;  %v1419_v22 = vadd.f32 %v2569_v6, %v1380_v18  ;;  %v1417_v23 = vadd.f32 %v2569_v6, %v1378_v19  ;;  %v1170_v3 = vld [vmem:[#allocation2 + $0x58] sm:$0xff] }
 0x2ab   : > { %v1245_v24 = vpop.permute.xlu1 %1244  ;;  %v1240_v25 = vpop.permute.xlu0 %1239  ;;  %v1169_v18 = vld [vmem:[#allocation2 + $0x38] sm:$0xff] }
 0x2ac   : > { %v1451_v26 = vmax.f32 %v1419_v22, 0.0  ;;  %v1449_v27 = vmax.f32 %v1417_v23, 0.0  ;;  %v1382_v28 = vmul.f32 %v1245_v24, %v1158_v20  ;;  %v1381_v29 = vmul.f32 %v1240_v25, %v1157_v21 }
 0x2ae   : > { %1483 = vst [vmem:[%s2341_s6 + $0x18] sm:$0xff] %v1451_v26  ;;  %1481 = vst [vmem:[%s2341_s6 + $0x8] sm:$0xff] %v1449_v27  ;;  %v1421_v32 = vadd.f32 %v2569_v6, %v1382_v28  ;;  %v1420_v33 = vadd.f32 %v2569_v6, %v1381_v29  ;;  %v1172_v27 = vld [vmem:[#allocation2 + $0xc8] sm:$0xff]  ;;  %v1171_v28 = vld [vmem:[#allocation2 + $0x40] sm:$0xff] }
 0x2af   : > { %v1255_v34 = vpop.permute.xlu1 %1254  ;;  %v1250_v35 = vpop.permute.xlu0 %1249 }
 0x2b0   : > { %v1453_v36 = vmax.f32 %v1421_v32, 0.0  ;;  %v1452_v37 = vmax.f32 %v1420_v33, 0.0  ;;  %v1384_v38 = vmul.f32 %v1255_v34, %v1160_v30  ;;  %v1383_v39 = vmul.f32 %v1250_v35, %v1159_v31 }
 0x2b2   : > { %1485 = vst [vmem:[%s2341_s6 + $0x28] sm:$0xff] %v1453_v36  ;;  %1484 = vst [vmem:[%s2341_s6 + $0x20] sm:$0xff] %v1452_v37  ;;  %v1423_v42 = vadd.f32 %v2569_v6, %v1384_v38  ;;  %v1422_v43 = vadd.f32 %v2569_v6, %v1383_v39  ;;  %v1174_v37 = vld [vmem:[#allocation2 + $0x90] sm:$0xff]  ;;  %v1173_v38 = vld [vmem:[#allocation2 + $0xe0] sm:$0xff] }
 0x2b3   : > { %v1265_v44 = vpop.permute.xlu1 %1264  ;;  %v1260_v45 = vpop.permute.xlu0 %1259 }
 0x2b4   : > { %v1455_v46 = vmax.f32 %v1423_v42, 0.0  ;;  %v1454_v47 = vmax.f32 %v1422_v43, 0.0  ;;  %v1386_v48 = vmul.f32 %v1265_v44, %v1162_v40  ;;  %v1385_v49 = vmul.f32 %v1260_v45, %v1161_v41 }
 0x2b6   : > { %1487 = vst [vmem:[%s2341_s6 + $0x38] sm:$0xff] %v1455_v46  ;;  %1486 = vst [vmem:[%s2341_s6 + $0x30] sm:$0xff] %v1454_v47  ;;  %v1425_v52 = vadd.f32 %v2569_v6, %v1386_v48  ;;  %v1424_v53 = vadd.f32 %v2569_v6, %v1385_v49  ;;  %v1176_v47 = vld [vmem:[#allocation2 + $0xc0] sm:$0xff]  ;;  %v1175_v48 = vld [vmem:[#allocation2 + $0x70] sm:$0xff] }
 0x2b7   : > { %v1275_v54 = vpop.permute.xlu1 %1274  ;;  %v1270_v55 = vpop.permute.xlu0 %1269 }
 0x2b8   : > { %v1457_v56 = vmax.f32 %v1425_v52, 0.0  ;;  %v1456_v57 = vmax.f32 %v1424_v53, 0.0  ;;  %v1388_v58 = vmul.f32 %v1275_v54, %v1164_v50  ;;  %v1387_v59 = vmul.f32 %v1270_v55, %v1163_v51 }
 0x2ba   : > { %1489 = vst [vmem:[%s2341_s6 + $0x48] sm:$0xff] %v1457_v56  ;;  %1488 = vst [vmem:[%s2341_s6 + $0x40] sm:$0xff] %v1456_v57  ;;  %v1427_v62 = vadd.f32 %v2569_v6, %v1388_v58  ;;  %v1426_v63 = vadd.f32 %v2569_v6, %v1387_v59  ;;  %v1178_v57 = vld [vmem:[#allocation2 + $0xd0] sm:$0xff]  ;;  %v1177_v58 = vld [vmem:[#allocation2 + $0xa8] sm:$0xff] }
 0x2bb   : > { %v1285_v0 = vpop.permute.xlu1 %1284  ;;  %v1280_v1 = vpop.permute.xlu0 %1279 }
 0x2bc   : > { %v1459_v2 = vmax.f32 %v1427_v62, 0.0  ;;  %v1458_v4 = vmax.f32 %v1426_v63, 0.0  ;;  %v1390_v5 = vmul.f32 %v1285_v0, %v1166_v60  ;;  %v1389_v7 = vmul.f32 %v1280_v1, %v1165_v61 }
 0x2be   : > { %1491 = vst [vmem:[%s2341_s6 + $0x58] sm:$0xff] %v1459_v2  ;;  %1490 = vst [vmem:[%s2341_s6 + $0x50] sm:$0xff] %v1458_v4  ;;  %v1429_v10 = vadd.f32 %v2569_v6, %v1390_v5  ;;  %v1428_v11 = vadd.f32 %v2569_v6, %v1389_v7  ;;  %v1180_v4 = vld [vmem:[#allocation2 + $0x28] sm:$0xff]  ;;  %v1179_v5 = vld [vmem:[#allocation2 + $0x10] sm:$0xff] }
 0x2bf   : > { %v1295_v12 = vpop.permute.xlu1 %1294  ;;  %v1290_v13 = vpop.permute.xlu0 %1289 }
 0x2c0   : > { %v1461_v14 = vmax.f32 %v1429_v10, 0.0  ;;  %v1460_v15 = vmax.f32 %v1428_v11, 0.0  ;;  %v1392_v16 = vmul.f32 %v1295_v12, %v1168_v8  ;;  %v1391_v17 = vmul.f32 %v1290_v13, %v1167_v9 }
 0x2c2   : > { %1493 = vst [vmem:[%s2341_s6 + $0x68] sm:$0xff] %v1461_v14  ;;  %1492 = vst [vmem:[%s2341_s6 + $0x60] sm:$0xff] %v1460_v15  ;;  %v1431_v19 = vadd.f32 %v2569_v6, %v1392_v16  ;;  %v1430_v20 = vadd.f32 %v2569_v6, %v1391_v17  ;;  %v1182_v15 = vld [vmem:[#allocation2 + $0xf8] sm:$0xff]  ;;  %v1181_v16 = vld [vmem:[#allocation2 + $0xa0] sm:$0xff] }
 0x2c3   : > { %v1305_v21 = vpop.permute.xlu1 %1304  ;;  %v1300_v22 = vpop.permute.xlu0 %1299 }
 0x2c4   : > { %v1463_v23 = vmax.f32 %v1431_v19, 0.0  ;;  %v1462_v24 = vmax.f32 %v1430_v20, 0.0  ;;  %v1394_v25 = vmul.f32 %v1305_v21, %v1170_v3  ;;  %v1393_v26 = vmul.f32 %v1300_v22, %v1169_v18 }
 0x2c6   : > { %1495 = vst [vmem:[%s2341_s6 + $0x78] sm:$0xff] %v1463_v23  ;;  %1494 = vst [vmem:[%s2341_s6 + $0x70] sm:$0xff] %v1462_v24  ;;  %v1433_v29 = vadd.f32 %v2569_v6, %v1394_v25  ;;  %v1432_v30 = vadd.f32 %v2569_v6, %v1393_v26  ;;  %v1184_v24 = vld [vmem:[#allocation2 + $0x98] sm:$0xff]  ;;  %v1183_v25 = vld [vmem:[#allocation2 + $0x20] sm:$0xff] }
 0x2c7   : > { %v1315_v31 = vpop.permute.xlu1 %1314  ;;  %v1310_v32 = vpop.permute.xlu0 %1309 }
 0x2c8   : > { %v1465_v33 = vmax.f32 %v1433_v29, 0.0  ;;  %v1464_v34 = vmax.f32 %v1432_v30, 0.0  ;;  %v1396_v35 = vmul.f32 %v1315_v31, %v1172_v27  ;;  %v1395_v36 = vmul.f32 %v1310_v32, %v1171_v28 }
 0x2ca   : > { %1497 = vst [vmem:[%s2341_s6 + $0x88] sm:$0xff] %v1465_v33  ;;  %1496 = vst [vmem:[%s2341_s6 + $0x80] sm:$0xff] %v1464_v34  ;;  %v1435_v39 = vadd.f32 %v2569_v6, %v1396_v35  ;;  %v1434_v40 = vadd.f32 %v2569_v6, %v1395_v36 }
 0x2cb   : > { %v1325_v41 = vpop.permute.xlu1 %1324  ;;  %v1320_v42 = vpop.permute.xlu0 %1319 }
 0x2cc   : > { %v1467_v43 = vmax.f32 %v1435_v39, 0.0  ;;  %v1466_v44 = vmax.f32 %v1434_v40, 0.0  ;;  %v1398_v45 = vmul.f32 %v1325_v41, %v1174_v37  ;;  %v1397_v46 = vmul.f32 %v1320_v42, %v1173_v38 }
 0x2ce   : > { %1499 = vst [vmem:[%s2341_s6 + $0x98] sm:$0xff] %v1467_v43  ;;  %1498 = vst [vmem:[%s2341_s6 + $0x90] sm:$0xff] %v1466_v44  ;;  %v1437_v49 = vadd.f32 %v2569_v6, %v1398_v45  ;;  %v1436_v50 = vadd.f32 %v2569_v6, %v1397_v46 }
 0x2cf   : > { %v1335_v51 = vpop.permute.xlu1 %1334  ;;  %v1330_v52 = vpop.permute.xlu0 %1329 }
 0x2d0   : > { %v1469_v53 = vmax.f32 %v1437_v49, 0.0  ;;  %v1468_v54 = vmax.f32 %v1436_v50, 0.0  ;;  %v1400_v55 = vmul.f32 %v1335_v51, %v1176_v47  ;;  %v1399_v56 = vmul.f32 %v1330_v52, %v1175_v48 }
 0x2d2   : > { %1501 = vst [vmem:[%s2341_s6 + $0xa8] sm:$0xff] %v1469_v53  ;;  %1500 = vst [vmem:[%s2341_s6 + $0xa0] sm:$0xff] %v1468_v54  ;;  %v1439_v59 = vadd.f32 %v2569_v6, %v1400_v55  ;;  %v1438_v60 = vadd.f32 %v2569_v6, %v1399_v56 }
 0x2d3   : > { %v1345_v61 = vpop.permute.xlu1 %1344  ;;  %v1340_v62 = vpop.permute.xlu0 %1339 }
 0x2d4   : > { %v1471_v63 = vmax.f32 %v1439_v59, 0.0  ;;  %v1470_v0 = vmax.f32 %v1438_v60, 0.0  ;;  %v1402_v1 = vmul.f32 %v1345_v61, %v1178_v57  ;;  %v1401_v2 = vmul.f32 %v1340_v62, %v1177_v58 }
 0x2d6   : > { %1503 = vst [vmem:[%s2341_s6 + $0xb8] sm:$0xff] %v1471_v63  ;;  %1502 = vst [vmem:[%s2341_s6 + $0xb0] sm:$0xff] %v1470_v0  ;;  %v1441_v7 = vadd.f32 %v2569_v6, %v1402_v1  ;;  %v1440_v8 = vadd.f32 %v2569_v6, %v1401_v2 }
 0x2d7   : > { %v1355_v9 = vpop.permute.xlu1 %1354  ;;  %v1350_v10 = vpop.permute.xlu0 %1349 }
 0x2d8   : > { %v1473_v11 = vmax.f32 %v1441_v7, 0.0  ;;  %v1472_v12 = vmax.f32 %v1440_v8, 0.0  ;;  %v1404_v13 = vmul.f32 %v1355_v9, %v1180_v4  ;;  %v1403_v14 = vmul.f32 %v1350_v10, %v1179_v5 }
 0x2da   : > { %1505 = vst [vmem:[%s2341_s6 + $0xc8] sm:$0xff] %v1473_v11  ;;  %1504 = vst [vmem:[%s2341_s6 + $0xc0] sm:$0xff] %v1472_v12  ;;  %v1443_v17 = vadd.f32 %v2569_v6, %v1404_v13  ;;  %v1442_v3 = vadd.f32 %v2569_v6, %v1403_v14 }
 0x2db   : > { %v1365_v18 = vpop.permute.xlu1 %1364  ;;  %v1360_v19 = vpop.permute.xlu0 %1359 }
 0x2dc   : > { %v1475_v20 = vmax.f32 %v1443_v17, 0.0  ;;  %v1474_v21 = vmax.f32 %v1442_v3, 0.0  ;;  %v1406_v22 = vmul.f32 %v1365_v18, %v1182_v15  ;;  %v1405_v23 = vmul.f32 %v1360_v19, %v1181_v16 }
 0x2de   : > { %1507 = vst [vmem:[%s2341_s6 + $0xd8] sm:$0xff] %v1475_v20  ;;  %1506 = vst [vmem:[%s2341_s6 + $0xd0] sm:$0xff] %v1474_v21  ;;  %v1445_v26 = vadd.f32 %v2569_v6, %v1406_v22  ;;  %v1444_v27 = vadd.f32 %v2569_v6, %v1405_v23 }
 0x2df   : > { %v1375_v28 = vpop.permute.xlu1 %1374  ;;  %v1370_v29 = vpop.permute.xlu0 %1369 }
 0x2e0   : > { %v1477_v30 = vmax.f32 %v1445_v26, 0.0  ;;  %v1476_v31 = vmax.f32 %v1444_v27, 0.0  ;;  %v1408_v32 = vmul.f32 %v1375_v28, %v1184_v24  ;;  %v1407_v33 = vmul.f32 %v1370_v29, %v1183_v25 }
 0x2e2   : > { %1509 = vst [vmem:[%s2341_s6 + $0xe8] sm:$0xff] %v1477_v30  ;;  %1508 = vst [vmem:[%s2341_s6 + $0xe0] sm:$0xff] %v1476_v31  ;;  %v1447_v34 = vadd.f32 %v2569_v6, %v1408_v32  ;;  %v1446_v35 = vadd.f32 %v2569_v6, %v1407_v33 }
 0x2e4   : > { %v1479_v36 = vmax.f32 %v1447_v34, 0.0  ;;  %v1478_v37 = vmax.f32 %v1446_v35, 0.0 }
 0x2e6   : > { %1511 = vst [vmem:[%s2341_s6 + $0xf8] sm:$0xff] %v1479_v36  ;;  %1510 = vst [vmem:[%s2341_s6 + $0xf0] sm:$0xff] %v1478_v37 }
 0x2e7 PF: > { %s2796_s0 = sld [smem:[#allocation19_spill]]  ;;  %s1526_s30 = sshll.u32 %s2341_s6, 4  ;;  %s2642_s30 = int_to_ptr.vmem [resolvable:$true] %s1526_s30 }
 0x2e8   : > { %s2798_s21 = sld [smem:[#allocation23_spill]]  ;;  %s2646_s24 = scalar_lea.sflag [#allocation5], %s298_s25 }
 0x2e9   : > { %s2799_s14 = sld [smem:[#allocation30_spill]]  ;;  %s1924_s5 = scalar_lea.vmem %s2642_s30, 4096 }
 0x2ea   : > { %p1925_p9 = scmp.ne.s32.totalorder %s2642_s30, %s1924_s5  ;;  %s2089_s2 = smov [#allocation9]  }
 0x2eb   : > { %s1928_s8 = sshll.u32 %s2089_s2, 4  ;;  %s1929_s8 = int_to_ptr.vmem [resolvable:$false] %s1928_s8 }
 0x2ec   : > { %s1930_s4 = scalar_lea.vmem %s1929_s8, 8192  ;;  %p1931_p7 = scmp.lt.s32.totalorder %s2642_s30, %s1929_s8 }
 0x2ed   : > { %s1687_s10 = sshll.u32 %s2796_s0, 12  ;;  %p1932_p11 = scmp.lt.s32.totalorder %s1930_s4, %s1924_s5 }
 0x2ee   : > { %p2800_p2 = scmp.ne.s32.totalorder %s2798_s21, 0 }
 0x2ef   : > { %s2639_s3 = scalar_lea.hbm %s2799_s14, %s1687_s10  ;;  %p1933_p0 = por %p1932_p11, %p1931_p7 }
 0x2f0   : > { %p1926_p12 = pnand %p1925_p9, %p2800_p2 }
 0x2f2   : > { %p1927_p5 = pneg %p1926_p12 }
 0x2f4   : > { %p1934_p1 = pnand %p1933_p0, %p1927_p5 }
 0x2f6   : > { %1937 = shalt.err (!%p1934_p1)
}
 0x2f7   : > { %s1938_s25 = scalar_lea.hbm %s2639_s3, 4096  ;;  %s1942_s16 = scalar_lea.hbm %s2799_s14, 16384 }
 0x2f8   : > { %p1939_p13 = scmp.ne.s32.totalorder %s2639_s3, %s1938_s25  ;;  %p1943_p4 = scmp.lt.s32.totalorder %s2639_s3, %s2799_s14 }
 0x2f9   : > { %p1944_p6 = scmp.lt.s32.totalorder %s1942_s16, %s1938_s25 }
 0x2fa   : > { %p1940_p3 = pnand %p1939_p13, %p2800_p2 }
 0x2fb   : > { %p1945_p8 = por %p1944_p6, %p1943_p4 }
 0x2fc   : > { %p1941_p10 = pneg %p1940_p3 }
 0x2fe   : > { %p1946_p9 = pnand %p1945_p8, %p1941_p10 }
 0x300   : > { %1949 = shalt.err (!%p1946_p9)
}
 0x301   : > { %s2090_s18 = smov 128   ;;  %s2091_s0 = smov 8  }
 0x302   : > { %1696 = dma.vmem_to_hbm [thread:$0]  (%p2800_p2), %s2642_s30, 4096, %s2639_s3, %s2646_s24, %s2090_s18, %s2090_s18, %s2091_s0  }
 0x303 PF: > { %s2801_s7 = sld [smem:[#allocation14_spill]]  ;;  %p1716_p12 = scmp.ge.s32.totalorder %s2076_s28, 2 }
 0x304   : > { %s2802_s10 = sld [smem:[#allocation24_spill]] }
 0x309   : > { %s1541_s15 = sand.u32 1, %s2801_s7  }
 0x30a   : > { %p2803_p5 = scmp.ne.s32.totalorder %s2802_s10, 0  ;;  %s1542_s9 = scalar_lea.sflag [#allocation5], %s1541_s15 }
 0x30c   : > { %p1710_p7 = pnand %p1716_p12, %p2803_p5 }
 0x30e   : > { %p1711_p11 = pneg %p1710_p7 }
 0x310   : > { %2019 = dma.done.wait (%p1711_p11), %s1542_s9, 4096  }
 0x311   : > { %2021 = vsyncadd (%p1711_p11), %s1542_s9, 4294963200  ;;  %s23_s28 = sadd.s32 1, %s2076_s28   ;;  %s2805_s15 = sld [smem:[#allocation15_spill]] }
 0x312   : > { %p2674_p0 = scmp.ge.s32.totalorder %s23_s28, 10   ;;  %s2806_s18 = sld [smem:[#allocation16_spill]] }
 0x313   : > { %s2807_s21 = sld [smem:[#allocation17_spill]]  ;;  %s2810_s16 = smov %s2032_s17 }
 0x314   : > { %s2808_s3 = sld [smem:[#allocation25_spill]]  ;;  %s2811_s17 = smov %s2287_s11 }
 0x315   : > { %s2809_s30 = sld [smem:[#allocation26_spill]]  ;;  %s2812_s19 = smov %s2044_s20 }
 0x316   : > { %s2813_s20 = smov %s2280_s12  ;;  %s2814_s22 = smov %s2056_s23 }
 0x317   : > { %s2815_s23 = smov %s2292_s29  ;;  %s2816_s24 = smov %s2068_s26 }
 0x318   : > { %s2817_s25 = smov %s2072_s27  ;;  %22 = sbr.rel (!%p2674_p0) target bundleno = 17 (0x11), region = 109 }
 0x31a   : > { %s2818_s26 = smov %s2808_s3 }
 0x31b   : > { %s2819_s27 = smov %s2809_s30 }
 0x31d   :  { %1547 = vsyncpa [#allocation4], 1 }
 0x31e   :  { %1549 = vsyncpa [#allocation4 + $0x1], 1 }
 0x31f   :  { %1550 = vsyncpa [#allocation7], 1 }
 0x320   :  { %1552 = vsyncpa [#allocation7 + $0x1], 1 }
 0x321   :  { %1553 = vsyncpa [#allocation5], 1 }
 0x322   :  { %1555 = vsyncpa [#allocation5 + $0x1], 1 }

</bundles_post_ra>
